<compile_context>
chip_gen: v7x
topology: tpu7x:2x2x1
jax: 0.10.0
libtpu: 0.0.40
codegen_flags: <defaults>
</compile_context>

<pallas_src>
import functools

import jax
import jax.numpy as jnp
from jax.experimental import pallas as pl
from jax.experimental.pallas import tpu as pltpu


# ----------------------------- fused Pallas kernel --------------------------

def _resnet6_fused_kernel(*refs, num_layers, has_reduce, k, kh_max,
                          dil_t, dil_s, Tt, Ts, pad_t, pad_s, scale):
    """Whole ResNet6 forward for one batch element, resident in VMEM/vregs.

    refs = [x, (reduce_w, reduce_b)?, 7 refs per layer ..., out, pad_scratch]
    per-layer refs: conv1_w, mconv_w (flattened masked taps), mconv_b,
                    fc1_w, fc1_b, fc2_w, fc2_b
    """
    idx = 0
    x_ref = refs[idx]; idx += 1
    if has_reduce:
        rw_ref, rb_ref = refs[idx], refs[idx + 1]
        idx += 2
    layer_refs = refs[idx: idx + 7 * num_layers]
    idx += 7 * num_layers
    o_ref = refs[idx]
    pad_ref = refs[idx + 1]

    M = Tt * Ts
    x = x_ref[0].astype(jnp.float32)                              # (M, C_in)
    if has_reduce:
        x = jnp.dot(x, rw_ref[...],
                    preferred_element_type=jnp.float32) + rb_ref[...]

    # Zero the conv halo once per grid step; the center is overwritten each
    # layer, the halo stays zero.
    pad_ref[...] = jnp.zeros_like(pad_ref)

    for li in range(num_layers):
        c1w, mw, mb, f1w, f1b, f2w, f2b = layer_refs[7 * li: 7 * li + 7]
        mid = c1w.shape[-1]

        residual = x
        # conv1: 1x1 Conv2d (bias=False) == channels-last matmul on the MXU.
        h = jnp.dot(x, c1w[...], preferred_element_type=jnp.float32)  # (M, mid)

        # Causal masked kxk conv: write into padded VMEM scratch, build an
        # im2col slab over the unmasked taps (kh <= k//2 on the target axis,
        # full extent over the source axis), then ONE matmul with K=taps*mid.
        pad_ref[pad_t:pad_t + Tt, pad_s:pad_s + Ts, :] = h.reshape(Tt, Ts, mid)
        taps = [pad_ref[kh * dil_t: kh * dil_t + Tt,
                        kw * dil_s: kw * dil_s + Ts, :]
                for kh in range(kh_max + 1) for kw in range(k)]
        col = jnp.concatenate(taps, axis=-1).reshape(M, (kh_max + 1) * k * mid)
        y = jnp.dot(col, mw[...], preferred_element_type=jnp.float32) + mb[...]

        x = y + residual
        if scale != 1.0:
            x = scale * x

        # FFN block: fc1 + relu + fc2 + residual, all in vregs (no HBM).
        residual = x
        hf = jnp.dot(x, f1w[...], preferred_element_type=jnp.float32) + f1b[...]
        hf = jnp.maximum(hf, 0.0)
        y = jnp.dot(hf, f2w[...], preferred_element_type=jnp.float32) + f2b[...]
        x = y + residual
        if scale != 1.0:
            x = scale * x

    o_ref[...] = x.reshape(1, M, x.shape[-1]).astype(o_ref.dtype)


# ----------------------------- parameter setup ------------------------------

def _xavier_uniform(key, fan_in, fan_out, shape=None):
    limit = (6.0 / (fan_in + fan_out)) ** 0.5
    shape = (fan_in, fan_out) if shape is None else shape
    return jax.random.uniform(key, shape, jnp.float32, -limit, limit)


def init_resnet6_params(key, num_init_features, cfg):
    params = {}
    num_features = num_init_features
    if cfg["divide_channels"] > 1:
        key, sub = jax.random.split(key)
        reduced = num_features // cfg["divide_channels"]
        params["reduce"] = (
            _xavier_uniform(sub, num_features, reduced),          # (in, out)
            jnp.zeros((1, reduced), jnp.float32),                 # (1, out)
        )
        num_features = reduced
    else:
        params["reduce"] = None

    mid = cfg["reduce_dim"]
    ffn = cfg["ffn_dim"]
    k = cfg["kernel_size"]
    kh_max = k // 2
    layers = []
    for _ in range(cfg["num_layers"]):
        key, k1, k2, k3, k4 = jax.random.split(key, 5)
        # TODO(synk): MaskedConvolution source not provided; modeled as a
        # Conv2d(mid -> num_features, (k,k), bias) whose kernel rows past the
        # center of the target axis are zeroed (causal), per pervasive-attn.
        # Only the unmasked rows are kept, pre-flattened to the im2col layout
        # ((kh, kw, cin) -> cout) so the kernel runs one matmul per conv.
        w_full = _xavier_uniform(k2, mid * k * k, num_features).reshape(
            k, k, mid, num_features)
        w_masked = w_full[:kh_max + 1].reshape((kh_max + 1) * k * mid,
                                               num_features)
        layers.append({
            "conv1_w": _xavier_uniform(k1, num_features, mid),   # 1x1, no bias
            "mconv_w": w_masked,
            "mconv_b": jnp.zeros((1, num_features), jnp.float32),
            "fc1_w": _xavier_uniform(k3, num_features, ffn),
            "fc1_b": jnp.zeros((1, ffn), jnp.float32),
            "fc2_w": _xavier_uniform(k4, ffn, num_features),
            "fc2_b": jnp.zeros((1, num_features), jnp.float32),
        })
    params["layers"] = layers
    params["output_channels"] = num_features
    return params


# ----------------------------- forward pass ---------------------------------

_LAYER_PARAM_ORDER = ("conv1_w", "mconv_w", "mconv_b",
                      "fc1_w", "fc1_b", "fc2_w", "fc2_b")


def _full_spec(arr):
    zeros = (0,) * arr.ndim
    return pl.BlockSpec(arr.shape, lambda b, _z=zeros: _z)


def resnet6_forward(x, params, cfg):
    """Input/Output: (B, Tt, Ts, C) — matches the PyTorch module (eval mode)."""
    B, Tt, Ts, C0 = x.shape
    k = cfg["kernel_size"]
    kh_max = k // 2
    dil_t, dil_s = cfg["target_dilation"], cfg["source_dilation"]
    pad_t = dil_t * (k - 1) // 2
    pad_s = dil_s * (k - 1) // 2
    mid = cfg["reduce_dim"]
    num_layers = cfg["num_layers"]
    C = params["output_channels"]
    has_reduce = params["reduce"] is not None
    M = Tt * Ts

    inputs = [x.reshape(B, M, C0)]          # contiguous reshape: free in XLA
    in_specs = [pl.BlockSpec((1, M, C0), lambda b: (b, 0, 0))]
    if has_reduce:
        rw, rb = params["reduce"]
        inputs += [rw, rb]
        in_specs += [_full_spec(rw), _full_spec(rb)]
    for lp in params["layers"]:
        for name in _LAYER_PARAM_ORDER:
            a = lp[name]
            inputs.append(a)
            in_specs.append(_full_spec(a))

    kernel = functools.partial(
        _resnet6_fused_kernel, num_layers=num_layers, has_reduce=has_reduce,
        k=k, kh_max=kh_max, dil_t=dil_t, dil_s=dil_s, Tt=Tt, Ts=Ts,
        pad_t=pad_t, pad_s=pad_s, scale=1.0)

    # NOTE: at production sizes, add an M (= Tt*Ts) grid axis with tiled
    # BlockSpecs sized against v7x's 64 MiB VMEM; at these toy sizes one block
    # per batch element keeps everything VMEM/vreg resident.
    out = pl.pallas_call(
        kernel,
        out_shape=jax.ShapeDtypeStruct((B, M, C), x.dtype),
        grid=(B,),
        in_specs=in_specs,
        out_specs=pl.BlockSpec((1, M, C), lambda b: (b, 0, 0)),
        scratch_shapes=[pltpu.VMEM((Tt + 2 * pad_t, Ts + 2 * pad_s, mid),
                                   jnp.float32)],
        compiler_params=pltpu.CompilerParams(
            dimension_semantics=("parallel",)),   # megacore on v7x; safe on v5e/v6e
    )(*inputs)
    return out.reshape(B, Tt, Ts, C)


# ----------------------------- main ------------------------------------------

if __name__ == "__main__":
    cfg = dict(
        num_layers=2,
        kernel_size=3,
        convolution_dropout=0.0,   # eval mode -> dropout is identity anyway
        ffn_dim=32,
        reduce_dim=8,
        conv_stride=1,
        source_dilation=1,
        target_dilation=1,
        maintain_resolution=True,
        divide_channels=2,
        layer_type="resnet",
    )

    B, Tt, Ts, C_in = 2, 8, 8, 16
    key = jax.random.PRNGKey(0)
    key, xkey, pkey = jax.random.split(key, 3)
    x = jax.random.normal(xkey, (B, Tt, Ts, C_in), jnp.float32)

    params = init_resnet6_params(pkey, C_in, cfg)

    fwd = jax.jit(lambda xx: resnet6_forward(xx, params, cfg))
    out = jax.block_until_ready(fwd(x))
    assert out.shape == (B, Tt, Ts, C_in // cfg["divide_channels"]), out.shape
    assert jnp.all(jnp.isfinite(out))
    print("KERNEL_OK")
</pallas_src>

<mosaic_0001>
module attributes {stable_mosaic.version = 11 : i64} {
  func.func @_resnet6_fused_kernel(%arg0: i32, %arg1: memref<1x64x16xf32, #tpu.memory_space<vmem>>, %arg2: memref<16x8xf32, #tpu.memory_space<vmem>>, %arg3: memref<1x8xf32, #tpu.memory_space<vmem>>, %arg4: memref<8x8xf32, #tpu.memory_space<vmem>>, %arg5: memref<48x8xf32, #tpu.memory_space<vmem>>, %arg6: memref<1x8xf32, #tpu.memory_space<vmem>>, %arg7: memref<8x32xf32, #tpu.memory_space<vmem>>, %arg8: memref<1x32xf32, #tpu.memory_space<vmem>>, %arg9: memref<32x8xf32, #tpu.memory_space<vmem>>, %arg10: memref<1x8xf32, #tpu.memory_space<vmem>>, %arg11: memref<8x8xf32, #tpu.memory_space<vmem>>, %arg12: memref<48x8xf32, #tpu.memory_space<vmem>>, %arg13: memref<1x8xf32, #tpu.memory_space<vmem>>, %arg14: memref<8x32xf32, #tpu.memory_space<vmem>>, %arg15: memref<1x32xf32, #tpu.memory_space<vmem>>, %arg16: memref<32x8xf32, #tpu.memory_space<vmem>>, %arg17: memref<1x8xf32, #tpu.memory_space<vmem>>, %arg18: memref<1x64x8xf32, #tpu.memory_space<vmem>>, %arg19: memref<10x10x8xf32, #tpu.memory_space<vmem>>) attributes {dimension_semantics = [#tpu.dimension_semantics<parallel>], iteration_bounds = array<i64: 2>, scalar_prefetch = 0 : i64, scratch_operands = 1 : i64, tpu.core_type = #tpu.core_type<tc>, window_params = [{transform_indices = @transform_0, window_bounds = array<i64: 1, 64, 16>}, {pipeline_mode = #tpu.pipeline_mode<synchronous>, transform_indices = @transform_1, window_bounds = array<i64: 16, 8>}, {pipeline_mode = #tpu.pipeline_mode<synchronous>, transform_indices = @transform_2, window_bounds = array<i64: 1, 8>}, {pipeline_mode = #tpu.pipeline_mode<synchronous>, transform_indices = @transform_3, window_bounds = array<i64: 8, 8>}, {pipeline_mode = #tpu.pipeline_mode<synchronous>, transform_indices = @transform_4, window_bounds = array<i64: 48, 8>}, {pipeline_mode = #tpu.pipeline_mode<synchronous>, transform_indices = @transform_5, window_bounds = array<i64: 1, 8>}, {pipeline_mode = #tpu.pipeline_mode<synchronous>, transform_indices = @transform_6, window_bounds = array<i64: 8, 32>}, {pipeline_mode = #tpu.pipeline_mode<synchronous>, transform_indices = @transform_7, window_bounds = array<i64: 1, 32>}, {pipeline_mode = #tpu.pipeline_mode<synchronous>, transform_indices = @transform_8, window_bounds = array<i64: 32, 8>}, {pipeline_mode = #tpu.pipeline_mode<synchronous>, transform_indices = @transform_9, window_bounds = array<i64: 1, 8>}, {pipeline_mode = #tpu.pipeline_mode<synchronous>, transform_indices = @transform_10, window_bounds = array<i64: 8, 8>}, {pipeline_mode = #tpu.pipeline_mode<synchronous>, transform_indices = @transform_11, window_bounds = array<i64: 48, 8>}, {pipeline_mode = #tpu.pipeline_mode<synchronous>, transform_indices = @transform_12, window_bounds = array<i64: 1, 8>}, {pipeline_mode = #tpu.pipeline_mode<synchronous>, transform_indices = @transform_13, window_bounds = array<i64: 8, 32>}, {pipeline_mode = #tpu.pipeline_mode<synchronous>, transform_indices = @transform_14, window_bounds = array<i64: 1, 32>}, {pipeline_mode = #tpu.pipeline_mode<synchronous>, transform_indices = @transform_15, window_bounds = array<i64: 32, 8>}, {pipeline_mode = #tpu.pipeline_mode<synchronous>, transform_indices = @transform_16, window_bounds = array<i64: 1, 8>}, {transform_indices = @transform_17, window_bounds = array<i64: 1, 64, 8>}]} {
    %c0 = arith.constant 0 : index
    %c0_0 = arith.constant 0 : index
    %c0_1 = arith.constant 0 : index
    %0 = vector.load %arg1[%c0, %c0_0, %c0_1] : memref<1x64x16xf32, #tpu.memory_space<vmem>>, vector<1x64x16xf32>
    %1 = vector.shape_cast %0 : vector<1x64x16xf32> to vector<64x16xf32>
    %c0_2 = arith.constant 0 : index
    %c0_3 = arith.constant 0 : index
    %2 = vector.load %arg2[%c0_2, %c0_3] : memref<16x8xf32, #tpu.memory_space<vmem>>, vector<16x8xf32>
    %cst = arith.constant dense<0.000000e+00> : vector<64x8xf32>
    %3 = tpu.matmul %1, %2, %cst {dimension_numbers = #tpu.dot_dimension_numbers<[1], [0], [0], [1], [0, 0, 1, 1], [], []>} : vector<64x16xf32>, vector<16x8xf32>, vector<64x8xf32> -> vector<64x8xf32>
    %c0_4 = arith.constant 0 : index
    %c0_5 = arith.constant 0 : index
    %4 = vector.load %arg3[%c0_4, %c0_5] : memref<1x8xf32, #tpu.memory_space<vmem>>, vector<1x8xf32>
    %5 = vector.broadcast %4 : vector<1x8xf32> to vector<64x8xf32>
    %6 = arith.addf %3, %5 : vector<64x8xf32>
    %cst_6 = arith.constant 0.000000e+00 : f32
    %7 = vector.broadcast %cst_6 : f32 to vector<10x10x8xf32>
    %c0_7 = arith.constant 0 : index
    %c0_8 = arith.constant 0 : index
    %c0_9 = arith.constant 0 : index
    %8 = vector.load %arg19[%c0_7, %c0_8, %c0_9] : memref<10x10x8xf32, #tpu.memory_space<vmem>>, vector<10x10x8xf32>
    tpu.vector_store %arg19[%c0_7, %c0_8, %c0_9], %7 {strides = array<i32>} : memref<10x10x8xf32, #tpu.memory_space<vmem>>, vector<10x10x8xf32>,
    %c0_10 = arith.constant 0 : index
    %c0_11 = arith.constant 0 : index
    %9 = vector.load %arg4[%c0_10, %c0_11] : memref<8x8xf32, #tpu.memory_space<vmem>>, vector<8x8xf32>
    %cst_12 = arith.constant dense<0.000000e+00> : vector<64x8xf32>
    %10 = tpu.matmul %6, %9, %cst_12 {dimension_numbers = #tpu.dot_dimension_numbers<[1], [0], [0], [1], [0, 0, 1, 1], [], []>} : vector<64x8xf32>, vector<8x8xf32>, vector<64x8xf32> -> vector<64x8xf32>
    %11 = vector.shape_cast %10 : vector<64x8xf32> to vector<8x8x8xf32>
    %c1 = arith.constant 1 : index
    %c1_13 = arith.constant 1 : index
    %c0_14 = arith.constant 0 : index
    %12 = vector.load %arg19[%c1, %c1_13, %c0_14] : memref<10x10x8xf32, #tpu.memory_space<vmem>>, vector<8x8x8xf32>
    tpu.vector_store %arg19[%c1, %c1_13, %c0_14], %11 {strides = array<i32>} : memref<10x10x8xf32, #tpu.memory_space<vmem>>, vector<8x8x8xf32>,
    %c0_15 = arith.constant 0 : index
    %c0_16 = arith.constant 0 : index
    %c0_17 = arith.constant 0 : index
    %13 = vector.load %arg19[%c0_15, %c0_16, %c0_17] : memref<10x10x8xf32, #tpu.memory_space<vmem>>, vector<8x8x8xf32>
    %c0_18 = arith.constant 0 : index
    %c1_19 = arith.constant 1 : index
    %c0_20 = arith.constant 0 : index
    %14 = vector.load %arg19[%c0_18, %c1_19, %c0_20] : memref<10x10x8xf32, #tpu.memory_space<vmem>>, vector<8x8x8xf32>
    %c0_21 = arith.constant 0 : index
    %c2 = arith.constant 2 : index
    %c0_22 = arith.constant 0 : index
    %15 = vector.load %arg19[%c0_21, %c2, %c0_22] : memref<10x10x8xf32, #tpu.memory_space<vmem>>, vector<8x8x8xf32>
    %c1_23 = arith.constant 1 : index
    %c0_24 = arith.constant 0 : index
    %c0_25 = arith.constant 0 : index
    %16 = vector.load %arg19[%c1_23, %c0_24, %c0_25] : memref<10x10x8xf32, #tpu.memory_space<vmem>>, vector<8x8x8xf32>
    %c1_26 = arith.constant 1 : index
    %c1_27 = arith.constant 1 : index
    %c0_28 = arith.constant 0 : index
    %17 = vector.load %arg19[%c1_26, %c1_27, %c0_28] : memref<10x10x8xf32, #tpu.memory_space<vmem>>, vector<8x8x8xf32>
    %c1_29 = arith.constant 1 : index
    %c2_30 = arith.constant 2 : index
    %c0_31 = arith.constant 0 : index
    %18 = vector.load %arg19[%c1_29, %c2_30, %c0_31] : memref<10x10x8xf32, #tpu.memory_space<vmem>>, vector<8x8x8xf32>
    %19 = tpu.concatenate %13, %14, %15, %16, %17, %18 in 2 : vector<8x8x8xf32>, vector<8x8x8xf32>, vector<8x8x8xf32>, vector<8x8x8xf32>, vector<8x8x8xf32>, vector<8x8x8xf32> -> vector<8x8x48xf32>
    %20 = vector.shape_cast %19 : vector<8x8x48xf32> to vector<64x48xf32>
    %c0_32 = arith.constant 0 : index
    %c0_33 = arith.constant 0 : index
    %21 = vector.load %arg5[%c0_32, %c0_33] : memref<48x8xf32, #tpu.memory_space<vmem>>, vector<48x8xf32>
    %cst_34 = arith.constant dense<0.000000e+00> : vector<64x8xf32>
    %22 = tpu.matmul %20, %21, %cst_34 {dimension_numbers = #tpu.dot_dimension_numbers<[1], [0], [0], [1], [0, 0, 1, 1], [], []>} : vector<64x48xf32>, vector<48x8xf32>, vector<64x8xf32> -> vector<64x8xf32>
    %c0_35 = arith.constant 0 : index
    %c0_36 = arith.constant 0 : index
    %23 = vector.load %arg6[%c0_35, %c0_36] : memref<1x8xf32, #tpu.memory_space<vmem>>, vector<1x8xf32>
    %24 = vector.broadcast %23 : vector<1x8xf32> to vector<64x8xf32>
    %25 = arith.addf %22, %24 : vector<64x8xf32>
    %26 = arith.addf %25, %6 : vector<64x8xf32>
    %c0_37 = arith.constant 0 : index
    %c0_38 = arith.constant 0 : index
    %27 = vector.load %arg7[%c0_37, %c0_38] : memref<8x32xf32, #tpu.memory_space<vmem>>, vector<8x32xf32>
    %cst_39 = arith.constant dense<0.000000e+00> : vector<64x32xf32>
    %28 = tpu.matmul %26, %27, %cst_39 {dimension_numbers = #tpu.dot_dimension_numbers<[1], [0], [0], [1], [0, 0, 1, 1], [], []>} : vector<64x8xf32>, vector<8x32xf32>, vector<64x32xf32> -> vector<64x32xf32>
    %c0_40 = arith.constant 0 : index
    %c0_41 = arith.constant 0 : index
    %29 = vector.load %arg8[%c0_40, %c0_41] : memref<1x32xf32, #tpu.memory_space<vmem>>, vector<1x32xf32>
    %30 = vector.broadcast %29 : vector<1x32xf32> to vector<64x32xf32>
    %31 = arith.addf %28, %30 : vector<64x32xf32>
    %cst_42 = arith.constant 0.000000e+00 : f32
    %32 = vector.broadcast %cst_42 : f32 to vector<64x32xf32>
    %33 = arith.maximumf %31, %32 : vector<64x32xf32>
    %c0_43 = arith.constant 0 : index
    %c0_44 = arith.constant 0 : index
    %34 = vector.load %arg9[%c0_43, %c0_44] : memref<32x8xf32, #tpu.memory_space<vmem>>, vector<32x8xf32>
    %cst_45 = arith.constant dense<0.000000e+00> : vector<64x8xf32>
    %35 = tpu.matmul %33, %34, %cst_45 {dimension_numbers = #tpu.dot_dimension_numbers<[1], [0], [0], [1], [0, 0, 1, 1], [], []>} : vector<64x32xf32>, vector<32x8xf32>, vector<64x8xf32> -> vector<64x8xf32>
    %c0_46 = arith.constant 0 : index
    %c0_47 = arith.constant 0 : index
    %36 = vector.load %arg10[%c0_46, %c0_47] : memref<1x8xf32, #tpu.memory_space<vmem>>, vector<1x8xf32>
    %37 = vector.broadcast %36 : vector<1x8xf32> to vector<64x8xf32>
    %38 = arith.addf %35, %37 : vector<64x8xf32>
    %39 = arith.addf %38, %26 : vector<64x8xf32>
    %c0_48 = arith.constant 0 : index
    %c0_49 = arith.constant 0 : index
    %40 = vector.load %arg11[%c0_48, %c0_49] : memref<8x8xf32, #tpu.memory_space<vmem>>, vector<8x8xf32>
    %cst_50 = arith.constant dense<0.000000e+00> : vector<64x8xf32>
    %41 = tpu.matmul %39, %40, %cst_50 {dimension_numbers = #tpu.dot_dimension_numbers<[1], [0], [0], [1], [0, 0, 1, 1], [], []>} : vector<64x8xf32>, vector<8x8xf32>, vector<64x8xf32> -> vector<64x8xf32>
    %42 = vector.shape_cast %41 : vector<64x8xf32> to vector<8x8x8xf32>
    %c1_51 = arith.constant 1 : index
    %c1_52 = arith.constant 1 : index
    %c0_53 = arith.constant 0 : index
    %43 = vector.load %arg19[%c1_51, %c1_52, %c0_53] : memref<10x10x8xf32, #tpu.memory_space<vmem>>, vector<8x8x8xf32>
    tpu.vector_store %arg19[%c1_51, %c1_52, %c0_53], %42 {strides = array<i32>} : memref<10x10x8xf32, #tpu.memory_space<vmem>>, vector<8x8x8xf32>,
    %c0_54 = arith.constant 0 : index
    %c0_55 = arith.constant 0 : index
    %c0_56 = arith.constant 0 : index
    %44 = vector.load %arg19[%c0_54, %c0_55, %c0_56] : memref<10x10x8xf32, #tpu.memory_space<vmem>>, vector<8x8x8xf32>
    %c0_57 = arith.constant 0 : index
    %c1_58 = arith.constant 1 : index
    %c0_59 = arith.constant 0 : index
    %45 = vector.load %arg19[%c0_57, %c1_58, %c0_59] : memref<10x10x8xf32, #tpu.memory_space<vmem>>, vector<8x8x8xf32>
    %c0_60 = arith.constant 0 : index
    %c2_61 = arith.constant 2 : index
    %c0_62 = arith.constant 0 : index
    %46 = vector.load %arg19[%c0_60, %c2_61, %c0_62] : memref<10x10x8xf32, #tpu.memory_space<vmem>>, vector<8x8x8xf32>
    %c1_63 = arith.constant 1 : index
    %c0_64 = arith.constant 0 : index
    %c0_65 = arith.constant 0 : index
    %47 = vector.load %arg19[%c1_63, %c0_64, %c0_65] : memref<10x10x8xf32, #tpu.memory_space<vmem>>, vector<8x8x8xf32>
    %c1_66 = arith.constant 1 : index
    %c1_67 = arith.constant 1 : index
    %c0_68 = arith.constant 0 : index
    %48 = vector.load %arg19[%c1_66, %c1_67, %c0_68] : memref<10x10x8xf32, #tpu.memory_space<vmem>>, vector<8x8x8xf32>
    %c1_69 = arith.constant 1 : index
    %c2_70 = arith.constant 2 : index
    %c0_71 = arith.constant 0 : index
    %49 = vector.load %arg19[%c1_69, %c2_70, %c0_71] : memref<10x10x8xf32, #tpu.memory_space<vmem>>, vector<8x8x8xf32>
    %50 = tpu.concatenate %44, %45, %46, %47, %48, %49 in 2 : vector<8x8x8xf32>, vector<8x8x8xf32>, vector<8x8x8xf32>, vector<8x8x8xf32>, vector<8x8x8xf32>, vector<8x8x8xf32> -> vector<8x8x48xf32>
    %51 = vector.shape_cast %50 : vector<8x8x48xf32> to vector<64x48xf32>
    %c0_72 = arith.constant 0 : index
    %c0_73 = arith.constant 0 : index
    %52 = vector.load %arg12[%c0_72, %c0_73] : memref<48x8xf32, #tpu.memory_space<vmem>>, vector<48x8xf32>
    %cst_74 = arith.constant dense<0.000000e+00> : vector<64x8xf32>
    %53 = tpu.matmul %51, %52, %cst_74 {dimension_numbers = #tpu.dot_dimension_numbers<[1], [0], [0], [1], [0, 0, 1, 1], [], []>} : vector<64x48xf32>, vector<48x8xf32>, vector<64x8xf32> -> vector<64x8xf32>
    %c0_75 = arith.constant 0 : index
    %c0_76 = arith.constant 0 : index
    %54 = vector.load %arg13[%c0_75, %c0_76] : memref<1x8xf32, #tpu.memory_space<vmem>>, vector<1x8xf32>
    %55 = vector.broadcast %54 : vector<1x8xf32> to vector<64x8xf32>
    %56 = arith.addf %53, %55 : vector<64x8xf32>
    %57 = arith.addf %56, %39 : vector<64x8xf32>
    %c0_77 = arith.constant 0 : index
    %c0_78 = arith.constant 0 : index
    %58 = vector.load %arg14[%c0_77, %c0_78] : memref<8x32xf32, #tpu.memory_space<vmem>>, vector<8x32xf32>
    %cst_79 = arith.constant dense<0.000000e+00> : vector<64x32xf32>
    %59 = tpu.matmul %57, %58, %cst_79 {dimension_numbers = #tpu.dot_dimension_numbers<[1], [0], [0], [1], [0, 0, 1, 1], [], []>} : vector<64x8xf32>, vector<8x32xf32>, vector<64x32xf32> -> vector<64x32xf32>
    %c0_80 = arith.constant 0 : index
    %c0_81 = arith.constant 0 : index
    %60 = vector.load %arg15[%c0_80, %c0_81] : memref<1x32xf32, #tpu.memory_space<vmem>>, vector<1x32xf32>
    %61 = vector.broadcast %60 : vector<1x32xf32> to vector<64x32xf32>
    %62 = arith.addf %59, %61 : vector<64x32xf32>
    %cst_82 = arith.constant 0.000000e+00 : f32
    %63 = vector.broadcast %cst_82 : f32 to vector<64x32xf32>
    %64 = arith.maximumf %62, %63 : vector<64x32xf32>
    %c0_83 = arith.constant 0 : index
    %c0_84 = arith.constant 0 : index
    %65 = vector.load %arg16[%c0_83, %c0_84] : memref<32x8xf32, #tpu.memory_space<vmem>>, vector<32x8xf32>
    %cst_85 = arith.constant dense<0.000000e+00> : vector<64x8xf32>
    %66 = tpu.matmul %64, %65, %cst_85 {dimension_numbers = #tpu.dot_dimension_numbers<[1], [0], [0], [1], [0, 0, 1, 1], [], []>} : vector<64x32xf32>, vector<32x8xf32>, vector<64x8xf32> -> vector<64x8xf32>
    %c0_86 = arith.constant 0 : index
    %c0_87 = arith.constant 0 : index
    %67 = vector.load %arg17[%c0_86, %c0_87] : memref<1x8xf32, #tpu.memory_space<vmem>>, vector<1x8xf32>
    %68 = vector.broadcast %67 : vector<1x8xf32> to vector<64x8xf32>
    %69 = arith.addf %66, %68 : vector<64x8xf32>
    %70 = arith.addf %69, %57 : vector<64x8xf32>
    %71 = vector.shape_cast %70 : vector<64x8xf32> to vector<1x64x8xf32>
    %c0_88 = arith.constant 0 : index
    %c0_89 = arith.constant 0 : index
    %c0_90 = arith.constant 0 : index
    %72 = vector.load %arg18[%c0_88, %c0_89, %c0_90] : memref<1x64x8xf32, #tpu.memory_space<vmem>>, vector<1x64x8xf32>
    tpu.vector_store %arg18[%c0_88, %c0_89, %c0_90], %71 {strides = array<i32>} : memref<1x64x8xf32, #tpu.memory_space<vmem>>, vector<1x64x8xf32>,
    return
  }
  func.func @transform_0(%arg0: i32) -> (i32, i32, i32) {
    %c0_i32 = arith.constant 0 : i32
    %c0_i32_0 = arith.constant 0 : i32
    %c0_i32_1 = arith.constant 0 : i32
    return %arg0, %c0_i32, %c0_i32_0 : i32, i32, i32
  }
  func.func @transform_1(%arg0: i32) -> (i32, i32) {
    %c0_i32 = arith.constant 0 : i32
    %c0_i32_0 = arith.constant 0 : i32
    %c0_i32_1 = arith.constant 0 : i32
    return %c0_i32, %c0_i32_0 : i32, i32
  }
  func.func @transform_2(%arg0: i32) -> (i32, i32) {
    %c0_i32 = arith.constant 0 : i32
    %c0_i32_0 = arith.constant 0 : i32
    %c0_i32_1 = arith.constant 0 : i32
    return %c0_i32, %c0_i32_0 : i32, i32
  }
  func.func @transform_3(%arg0: i32) -> (i32, i32) {
    %c0_i32 = arith.constant 0 : i32
    %c0_i32_0 = arith.constant 0 : i32
    %c0_i32_1 = arith.constant 0 : i32
    return %c0_i32, %c0_i32_0 : i32, i32
  }
  func.func @transform_4(%arg0: i32) -> (i32, i32) {
    %c0_i32 = arith.constant 0 : i32
    %c0_i32_0 = arith.constant 0 : i32
    %c0_i32_1 = arith.constant 0 : i32
    return %c0_i32, %c0_i32_0 : i32, i32
  }
  func.func @transform_5(%arg0: i32) -> (i32, i32) {
    %c0_i32 = arith.constant 0 : i32
    %c0_i32_0 = arith.constant 0 : i32
    %c0_i32_1 = arith.constant 0 : i32
    return %c0_i32, %c0_i32_0 : i32, i32
  }
  func.func @transform_6(%arg0: i32) -> (i32, i32) {
    %c0_i32 = arith.constant 0 : i32
    %c0_i32_0 = arith.constant 0 : i32
    %c0_i32_1 = arith.constant 0 : i32
    return %c0_i32, %c0_i32_0 : i32, i32
  }
  func.func @transform_7(%arg0: i32) -> (i32, i32) {
    %c0_i32 = arith.constant 0 : i32
    %c0_i32_0 = arith.constant 0 : i32
    %c0_i32_1 = arith.constant 0 : i32
    return %c0_i32, %c0_i32_0 : i32, i32
  }
  func.func @transform_8(%arg0: i32) -> (i32, i32) {
    %c0_i32 = arith.constant 0 : i32
    %c0_i32_0 = arith.constant 0 : i32
    %c0_i32_1 = arith.constant 0 : i32
    return %c0_i32, %c0_i32_0 : i32, i32
  }
  func.func @transform_9(%arg0: i32) -> (i32, i32) {
    %c0_i32 = arith.constant 0 : i32
    %c0_i32_0 = arith.constant 0 : i32
    %c0_i32_1 = arith.constant 0 : i32
    return %c0_i32, %c0_i32_0 : i32, i32
  }
  func.func @transform_10(%arg0: i32) -> (i32, i32) {
    %c0_i32 = arith.constant 0 : i32
    %c0_i32_0 = arith.constant 0 : i32
    %c0_i32_1 = arith.constant 0 : i32
    return %c0_i32, %c0_i32_0 : i32, i32
  }
  func.func @transform_11(%arg0: i32) -> (i32, i32) {
    %c0_i32 = arith.constant 0 : i32
    %c0_i32_0 = arith.constant 0 : i32
    %c0_i32_1 = arith.constant 0 : i32
    return %c0_i32, %c0_i32_0 : i32, i32
  }
  func.func @transform_12(%arg0: i32) -> (i32, i32) {
    %c0_i32 = arith.constant 0 : i32
    %c0_i32_0 = arith.constant 0 : i32
    %c0_i32_1 = arith.constant 0 : i32
    return %c0_i32, %c0_i32_0 : i32, i32
  }
  func.func @transform_13(%arg0: i32) -> (i32, i32) {
    %c0_i32 = arith.constant 0 : i32
    %c0_i32_0 = arith.constant 0 : i32
    %c0_i32_1 = arith.constant 0 : i32
    return %c0_i32, %c0_i32_0 : i32, i32
  }
  func.func @transform_14(%arg0: i32) -> (i32, i32) {
    %c0_i32 = arith.constant 0 : i32
    %c0_i32_0 = arith.constant 0 : i32
    %c0_i32_1 = arith.constant 0 : i32
    return %c0_i32, %c0_i32_0 : i32, i32
  }
  func.func @transform_15(%arg0: i32) -> (i32, i32) {
    %c0_i32 = arith.constant 0 : i32
    %c0_i32_0 = arith.constant 0 : i32
    %c0_i32_1 = arith.constant 0 : i32
    return %c0_i32, %c0_i32_0 : i32, i32
  }
  func.func @transform_16(%arg0: i32) -> (i32, i32) {
    %c0_i32 = arith.constant 0 : i32
    %c0_i32_0 = arith.constant 0 : i32
    %c0_i32_1 = arith.constant 0 : i32
    return %c0_i32, %c0_i32_0 : i32, i32
  }
  func.func @transform_17(%arg0: i32) -> (i32, i32, i32) {
    %c0_i32 = arith.constant 0 : i32
    %c0_i32_0 = arith.constant 0 : i32
    %c0_i32_1 = arith.constant 0 : i32
    return %arg0, %c0_i32, %c0_i32_0 : i32, i32, i32
  }
}

</mosaic_0001>

<bundles_post_ra>
// kernel: _lambda_.1
= control target key start
LH: loop header
LB: loop body
LE: loop exit
PB: predicated region body
PF: predicated region fallthrough
CT: control target
= control target key end

     0   :  { %s4494_s0 = inlined_call_operand.hbm [shape: f32[2,64,16], index: 0, kind: input, shape index: {}]   ;;  %s4495_s1 = inlined_call_operand.vmem [shape: f32[16,8], index: 1, kind: input, shape index: {}]   ;;  %s4496_s2 = inlined_call_operand.vmem [shape: f32[1,8], index: 2, kind: input, shape index: {}, may-alias: {2,5,9,12,16}]   ;;  %s4497_s3 = inlined_call_operand.hbm [shape: f32[8,8], index: 3, kind: input, shape index: {}]   ;;  %s4498_s4 = inlined_call_operand.hbm [shape: f32[48,8], index: 4, kind: input, shape index: {}]   ;;  %s4499_s5 = inlined_call_operand.vmem [shape: f32[1,8], index: 5, kind: input, shape index: {}, may-alias: {2,5,9,12,16}]   ;;  %s4500_s6 = inlined_call_operand.hbm [shape: f32[8,32], index: 6, kind: input, shape index: {}]   ;;  %s4501_s7 = inlined_call_operand.vmem [shape: f32[1,32], index: 7, kind: input, shape index: {}, may-alias: {7,14}]   ;;  %s4502_s8 = inlined_call_operand.hbm [shape: f32[32,8], index: 8, kind: input, shape index: {}]   ;;  %s4503_s9 = inlined_call_operand.vmem [shape: f32[1,8], index: 9, kind: input, shape index: {}, may-alias: {2,5,9,12,16}]   ;;  %s4504_s10 = inlined_call_operand.hbm [shape: f32[8,8], index: 10, kind: input, shape index: {}]   ;;  %s4505_s11 = inlined_call_operand.hbm [shape: f32[48,8], index: 11, kind: input, shape index: {}]   ;;  %s4506_s12 = inlined_call_operand.vmem [shape: f32[1,8], index: 12, kind: input, shape index: {}, may-alias: {2,5,9,12,16}]   ;;  %s4507_s13 = inlined_call_operand.hbm [shape: f32[8,32], index: 13, kind: input, shape index: {}]   ;;  %s4508_s14 = inlined_call_operand.vmem [shape: f32[1,32], index: 14, kind: input, shape index: {}, may-alias: {7,14}]   ;;  %s4509_s15 = inlined_call_operand.vmem [shape: f32[32,8], index: 15, kind: input, shape index: {}]   ;;  %s4510_s16 = inlined_call_operand.vmem [shape: f32[1,8], index: 16, kind: input, shape index: {}, may-alias: {2,5,9,12,16}]   ;;  %s4511_s17 = inlined_call_operand.hbm [shape: f32[2,64,8], index: 17, kind: output, shape index: {}]  }
   0x1   :  { %4523 = sst [smem:[#allocation24_spill]] %s4494_s0 }
   0x2   :  { %4524 = sst [smem:[#allocation25_spill]] %s4495_s1 }
   0x3   :  { %4525 = sst [smem:[#allocation26_spill]] %s4497_s3 }
   0x4   :  { %4526 = sst [smem:[#allocation27_spill]] %s4498_s4 }
   0x5   :  { %4527 = sst [smem:[#allocation28_spill]] %s4503_s9 }
   0x6   :  { %4528 = sst [smem:[#allocation29_spill]] %s4506_s12 }
   0x7   :  { %4529 = sst [smem:[#allocation30_spill]] %s4508_s14 }
   0x8   :  { %4530 = sst [smem:[#allocation31_spill]] %s4509_s15 }
   0x9   :  { %4531 = sst [smem:[#allocation32_spill]] %s4510_s16 }
   0xa   :  { %4532 = sst [smem:[#allocation33_spill]] %s4511_s17 }
   0xb   :  { %22 = vsyncpa [#allocation4], 0 }
   0xc   :  { %24 = vsyncpa [#allocation4 + $0x1], 0 }
   0xd   :  { %25 = vsyncpa [#allocation7], 0 }
   0xe   :  { %26 = vsyncpa [#allocation10], 0 }
   0xf   :  { %27 = vsyncpa [#allocation13], 0 }
  0x10   :  { %28 = vsyncpa [#allocation16], 0 }
  0x11   :  { %29 = vsyncpa [#allocation5], 0 }
  0x12   :  { %31 = vsyncpa [#allocation5 + $0x1], 0  ;;  %s3616_s24 = smov 0   ;;  %s3618_s25 = smov 0  }
  0x13   :  { %s3620_s26 = smov 0   ;;  %s3622_s27 = smov 0  }
  0x14 LB: > { %s3508_s28 = smov [#allocation6]   ;;  %s3637_s0 = sadd.s32 4294967295, %s3506_s27   ;;  %s3506_s27 = sphi %s3622_s27, %s4570_s27   ;;  %s3502_s26 = sphi %s3620_s26, %s4569_s26   ;;  %s3498_s25 = sphi %s3618_s25, %s4568_s25   ;;  %s3494_s24 = sphi %s3616_s24, %s4567_s24  }
  0x15   : > { %s449_s29 = sshll.u32 %s3508_s28, 4  ;;  %p2656_p0 = scmp.ge.s32.totalorder %s3506_s27, 1  ;;  %s3642_s29 = int_to_ptr.vmem [resolvable:$true] %s449_s29 }
  0x16   : > { %p4516_p1 = scmp.eq.s32.totalorder %s3637_s0, 0  ;;  %p430_p2 = scmp.lt.s32.totalorder %s3506_s27, 3 }
  0x17   : > { %s3509_s18 = smov [#allocation9]   ;;  %s3510_s1 = smov [#allocation12]  }
  0x18   : > { %p3644_p3 = pnand %p2656_p0, %p430_p2  ;;  %s476_s19 = sshll.u32 %s3509_s18, 4  ;;  %s3651_s19 = int_to_ptr.vmem [resolvable:$true] %s476_s19 }
  0x19   : > { %s506_s20 = sshll.u32 %s3510_s1, 4  ;;  %s3511_s22 = smov [#allocation8]   ;;  %s3659_s20 = int_to_ptr.vmem [resolvable:$true] %s506_s20 }
  0x1a   : > { %s4533_s30 = scalar_select %p3644_p3, 1, 0 }
  0x1b   : > { %p3104_p5 = pneg %p3644_p3  ;;  %s3661_s23 = sshll.u32 %s3511_s22, 4  ;;  %s460_s23 = int_to_ptr.vmem [resolvable:$true] %s3661_s23 }
  0x1c   : > { %s4535_s3 = sld [smem:[#allocation26_spill]] }
  0x1d   : > { %p3655_p6 = pnand %p3104_p5, %p4516_p1 }
  0x1f   : > { %p3671_p8 = pneg %p3655_p6 }
  0x22   : > { %s3198_s16 = scalar_lea.hbm %s4535_s3, 128 }
  0x23   : > { %p3199_p7 = scmp.ne.s32.totalorder %s4535_s3, %s3198_s16  ;;  %p3205_p11 = scmp.lt.u32.totalorder %s3198_s16, %s4535_s3 }
  0x25   : > { %p3201_p9 = pnand %p3671_p8, %p3199_p7 }
  0x27   : > { %p3202_p10 = pneg %p3201_p9 }
  0x29   : > { %p3207_p12 = pnand %p3205_p11, %p3202_p10 }
  0x2b   : > { %3210 = shalt.err (!%p3207_p12)
}
  0x2c   : > { %s3211_s14 = scalar_lea.vmem %s3642_s29, 128  ;;  %p3219_p5 = scmp.lt.s32.totalorder %s3642_s29, %s3642_s29 }
  0x2d   : > { %p3212_p13 = scmp.ne.s32.totalorder %s3642_s29, %s3211_s14  ;;  %p3220_p4 = scmp.lt.s32.totalorder %s3211_s14, %s3211_s14 }
  0x2f   : > { %p3214_p0 = pnand %p3212_p13, %p3671_p8  ;;  %p3221_p7 = por %p3220_p4, %p3219_p5 }
  0x31   : > { %p3215_p2 = pneg %p3214_p0 }
  0x33   : > { %p3222_p9 = pnand %p3221_p7, %p3215_p2 }
  0x35   : > { %3225 = shalt.err (!%p3222_p9)
}
  0x36   : > { %3107 = dma.hbm_to_vmem [thread:$0]  (!%p3655_p6), %s4535_s3, 128, %s3642_s29, [#allocation7]  }
  0x37   : > { %s3226_s18 = scalar_lea.hbm %s4500_s6, 128 }
  0x38   : > { %p3227_p10 = scmp.ne.s32.totalorder %s4500_s6, %s3226_s18  ;;  %p3233_p12 = scmp.lt.u32.totalorder %s3226_s18, %s4500_s6 }
  0x3a   : > { %p3229_p4 = pnand %p3227_p10, %p3671_p8 }
  0x3c   : > { %p3230_p11 = pneg %p3229_p4 }
  0x3e   : > { %p3235_p13 = pnand %p3233_p12, %p3230_p11 }
  0x40   : > { %3238 = shalt.err (!%p3235_p13)
}
  0x41   : > { %s3239_s29 = scalar_lea.vmem %s3651_s19, 128  ;;  %p3247_p7 = scmp.lt.s32.totalorder %s3651_s19, %s3651_s19 }
  0x42   : > { %p3240_p0 = scmp.ne.s32.totalorder %s3651_s19, %s3239_s29  ;;  %p3248_p9 = scmp.lt.s32.totalorder %s3239_s29, %s3239_s29 }
  0x44   : > { %p3242_p2 = pnand %p3240_p0, %p3671_p8  ;;  %p3249_p10 = por %p3248_p9, %p3247_p7 }
  0x46   : > { %p3243_p5 = pneg %p3242_p2 }
  0x48   : > { %p3250_p4 = pnand %p3249_p10, %p3243_p5 }
  0x4a   : > { %3253 = shalt.err (!%p3250_p4)
}
  0x4b   : > { %3113 = dma.hbm_to_vmem [thread:$0]  (!%p3655_p6), %s4500_s6, 128, %s3651_s19, [#allocation10]  }
  0x4c   : > { %s3254_s17 = scalar_lea.hbm %s4504_s10, 128 }
  0x4d   : > { %p3255_p11 = scmp.ne.s32.totalorder %s4504_s10, %s3254_s17  ;;  %p3261_p0 = scmp.lt.u32.totalorder %s3254_s17, %s4504_s10 }
  0x4f   : > { %p3257_p12 = pnand %p3255_p11, %p3671_p8 }
  0x51   : > { %p3258_p13 = pneg %p3257_p12 }
  0x53   : > { %p3263_p2 = pnand %p3261_p0, %p3258_p13 }
  0x55   : > { %3266 = shalt.err (!%p3263_p2)
}
  0x56   : > { %s3267_s19 = scalar_lea.vmem %s3659_s20, 128  ;;  %p3275_p10 = scmp.lt.s32.totalorder %s3659_s20, %s3659_s20 }
  0x57   : > { %p3268_p5 = scmp.ne.s32.totalorder %s3659_s20, %s3267_s19  ;;  %p3276_p4 = scmp.lt.s32.totalorder %s3267_s19, %s3267_s19 }
  0x59   : > { %p3270_p7 = pnand %p3268_p5, %p3671_p8  ;;  %p3277_p11 = por %p3276_p4, %p3275_p10 }
  0x5b   : > { %p3271_p9 = pneg %p3270_p7 }
  0x5d   : > { %p3278_p12 = pnand %p3277_p11, %p3271_p9 }
  0x5f   : > { %3281 = shalt.err (!%p3278_p12)
}
  0x60   : > { %3119 = dma.hbm_to_vmem [thread:$0]  (!%p3655_p6), %s4504_s10, 128, %s3659_s20, [#allocation13]  }
  0x61   : > { %s4537_s4 = sld [smem:[#allocation27_spill]] }
  0x67   : > { %s3282_s16 = scalar_lea.hbm %s4537_s4, 768 }
  0x68   : > { %p3283_p13 = scmp.ne.s32.totalorder %s4537_s4, %s3282_s16  ;;  %p3289_p5 = scmp.lt.u32.totalorder %s3282_s16, %s4537_s4 }
  0x6a   : > { %p3285_p0 = pnand %p3283_p13, %p3671_p8 }
  0x6c   : > { %p3286_p2 = pneg %p3285_p0 }
  0x6e   : > { %p3291_p7 = pnand %p3289_p5, %p3286_p2 }
  0x70   : > { %3294 = shalt.err (!%p3291_p7)
}
  0x71   : > { %s3295_s14 = scalar_lea.vmem %s460_s23, 768  ;;  %p3303_p11 = scmp.lt.s32.totalorder %s460_s23, %s460_s23 }
  0x72   : > { %p3296_p9 = scmp.ne.s32.totalorder %s460_s23, %s3295_s14  ;;  %p3304_p12 = scmp.lt.s32.totalorder %s3295_s14, %s3295_s14 }
  0x74   : > { %p3298_p10 = pnand %p3296_p9, %p3671_p8  ;;  %p3305_p1 = por %p3304_p12, %p3303_p11 }
  0x76   : > { %p3299_p4 = pneg %p3298_p10 }
  0x78   : > { %p3306_p3 = pnand %p3305_p1, %p3299_p4 }
  0x7a   : > { %3309 = shalt.err (!%p3306_p3)
}
  0x7b   : > { %s4518_s20 = smov 128   ;;  %s4519_s19 = smov 8  }
  0x7c   : > { %3110 = dma.hbm_to_vmem [thread:$0]  (!%p3655_p6), %s4537_s4, 768, %s460_s23, [#allocation7], %s4518_s20, %s4518_s20, %s4519_s19  }
  0x7d   : > { %s3514_s15 = smov [#allocation11]   ;;  %s3515_s16 = smov [#allocation14]  }
  0x7e   : > { %s489_s12 = sshll.u32 %s3514_s15, 4  ;;  %s516_s17 = sshll.u32 %s3515_s16, 4  ;;  %s490_s12 = int_to_ptr.vmem [resolvable:$true] %s489_s12  ;;  %s3760_s17 = int_to_ptr.vmem [resolvable:$true] %s516_s17 }
  0x7f   : > { %s3310_s22 = scalar_lea.hbm %s4502_s8, 512 }
  0x80   : > { %p3311_p1 = scmp.ne.s32.totalorder %s4502_s8, %s3310_s22  ;;  %p3317_p0 = scmp.lt.u32.totalorder %s3310_s22, %s4502_s8 }
  0x82   : > { %p3313_p3 = pnand %p3311_p1, %p3671_p8 }
  0x84   : > { %p3314_p13 = pneg %p3313_p3 }
  0x86   : > { %p3319_p2 = pnand %p3317_p0, %p3314_p13 }
  0x88   : > { %3322 = shalt.err (!%p3319_p2)
}
  0x89   : > { %s3323_s9 = scalar_lea.vmem %s490_s12, 512  ;;  %p3331_p10 = scmp.lt.s32.totalorder %s490_s12, %s490_s12 }
  0x8a   : > { %p3324_p5 = scmp.ne.s32.totalorder %s490_s12, %s3323_s9  ;;  %p3332_p4 = scmp.lt.s32.totalorder %s3323_s9, %s3323_s9 }
  0x8c   : > { %p3326_p7 = pnand %p3324_p5, %p3671_p8  ;;  %p3333_p11 = por %p3332_p4, %p3331_p10 }
  0x8e   : > { %p3327_p9 = pneg %p3326_p7 }
  0x90   : > { %p3334_p12 = pnand %p3333_p11, %p3327_p9 }
  0x92   : > { %3337 = shalt.err (!%p3334_p12)
}
  0x93   : > { %3116 = dma.hbm_to_vmem [thread:$0]  (!%p3655_p6), %s4502_s8, 512, %s490_s12, [#allocation10], %s4518_s20, %s4518_s20, %s4519_s19  }
  0x94   : > { %s3338_s18 = scalar_lea.hbm %s4505_s11, 768 }
  0x95   : > { %p3339_p1 = scmp.ne.s32.totalorder %s4505_s11, %s3338_s18  ;;  %p3345_p0 = scmp.lt.u32.totalorder %s3338_s18, %s4505_s11 }
  0x97   : > { %p3341_p3 = pnand %p3339_p1, %p3671_p8 }
  0x99   : > { %p3342_p13 = pneg %p3341_p3 }
  0x9b   : > { %p3347_p2 = pnand %p3345_p0, %p3342_p13 }
  0x9d   : > { %3350 = shalt.err (!%p3347_p2)
}
  0x9e   : > { %s3351_s12 = scalar_lea.vmem %s3760_s17, 768  ;;  %p3359_p10 = scmp.lt.s32.totalorder %s3760_s17, %s3760_s17 }
  0x9f   : > { %p3352_p5 = scmp.ne.s32.totalorder %s3760_s17, %s3351_s12  ;;  %p3360_p4 = scmp.lt.s32.totalorder %s3351_s12, %s3351_s12 }
  0xa1   : > { %p3354_p7 = pnand %p3352_p5, %p3671_p8  ;;  %p3361_p11 = por %p3360_p4, %p3359_p10 }
  0xa3   : > { %p3355_p9 = pneg %p3354_p7 }
  0xa5   : > { %p3362_p12 = pnand %p3361_p11, %p3355_p9 }
  0xa7   : > { %3365 = shalt.err (!%p3362_p12)
}
  0xa8   : > { %3122 = dma.hbm_to_vmem [thread:$0]  (!%p3655_p6), %s4505_s11, 768, %s3760_s17, [#allocation13], %s4518_s20, %s4518_s20, %s4519_s19  }
  0xa9   : > { %s3516_s15 = smov [#allocation15]   ;;  %s3366_s22 = scalar_lea.hbm %s4507_s13, 128 }
  0xaa   : > { %s533_s16 = sshll.u32 %s3516_s15, 4  ;;  %p3367_p1 = scmp.ne.s32.totalorder %s4507_s13, %s3366_s22  ;;  %s534_s16 = int_to_ptr.vmem [resolvable:$true] %s533_s16 }
  0xab   : > { %p3373_p0 = scmp.lt.u32.totalorder %s3366_s22, %s4507_s13 }
  0xac   : > { %p3369_p3 = pnand %p3367_p1, %p3671_p8 }
  0xae   : > { %p3370_p13 = pneg %p3369_p3 }
  0xb0   : > { %p3375_p2 = pnand %p3373_p0, %p3370_p13 }
  0xb2   : > { %3378 = shalt.err (!%p3375_p2)
}
  0xb3   : > { %s3379_s17 = scalar_lea.vmem %s534_s16, 128  ;;  %p3387_p10 = scmp.lt.s32.totalorder %s534_s16, %s534_s16 }
  0xb4   : > { %p3380_p5 = scmp.ne.s32.totalorder %s534_s16, %s3379_s17  ;;  %p3388_p4 = scmp.lt.s32.totalorder %s3379_s17, %s3379_s17 }
  0xb6   : > { %p3382_p7 = pnand %p3380_p5, %p3671_p8  ;;  %p3389_p11 = por %p3388_p4, %p3387_p10 }
  0xb8   : > { %p3383_p9 = pneg %p3382_p7 }
  0xba   : > { %p3390_p12 = pnand %p3389_p11, %p3383_p9 }
  0xbc   : > { %3393 = shalt.err (!%p3390_p12)
}
  0xbd   : > { %3125 = dma.hbm_to_vmem [thread:$0]  (!%p3655_p6), %s4507_s13, 128, %s534_s16, [#allocation16]  }
  0xbe   : > { %s2655_s1 = sadd.s32 4294967294, %s3506_s27   ;;  %s3829_s21 = sadd.s32 1, %s3506_s27  }
  0xbf   : > { %s44_s15 = sadd.s32 1, %s3502_s26  ;;  %s41_s28 = ssub.s32 %s3506_s27, %s3829_s21 }
  0xc0   : > { %p51_p8 = scmp.ne.s32.totalorder %s3502_s26, %s3498_s25  ;;  %p42_p1 = scmp.eq.s32.totalorder %s41_s28, 0 }
  0xc1   : > { %p52_p3 = scmp.eq.s32.totalorder %s3506_s27, 0  ;;  %p57_p13 = scmp.ne.s32.totalorder %s3498_s25, %s3494_s24 }
  0xc2   : > { %p417_p0 = scmp.eq.s32.totalorder %s3637_s0, 1  ;;  %p4538_p5 = scmp.eq.s32.totalorder %s3637_s0, 0 }
  0xc3   : > { %s3841_s18 = scalar_select %p42_p1, %s3502_s26, %s44_s15  }
  0xc4   : > { %p53_p2 = por %p52_p3, %p51_p8  ;;  %p3845_p7 = por %p4538_p5, %p57_p13 }
  0xc5   : > { %p3849_p6 = por %p417_p0, %p51_p8  ;;  %p423_p9 = scmp.eq.s32.totalorder %s2655_s1, 1 }
  0xc6   : > { %p3141_p10 = scmp.lt.s32.totalorder %s3506_s27, 2  ;;  %s553_s14 = sand.u32 1, %s3502_s26  }
  0xc7   : > { %s4540_s16 = scalar_select %p3849_p6, 1, 0 }
  0xc8   : > { %p3855_p4 = por %p423_p9, %p57_p13  ;;  %s2665_s23 = sshll.u32 %s553_s14, 6 }
  0xc9   : > { %s2762_s12 = sshll.u32 %s3506_s27, 10  ;;  %s4542_s3 = sld [smem:[#allocation24_spill]] }
  0xca   : > { %s4541_s29 = scalar_select %p3855_p4, 1, 0 }
  0xcb   : > { %s557_s28 = scalar_lea.vmem [#allocation3], %s2665_s23  ;;  %p3865_p11 = pnand %p3141_p10, %p53_p2 }
  0xcc   : > { %s564_s20 = sshll.u32 %s557_s28, 4  ;;  %s3871_s19 = scalar_lea.sflag [#allocation4], %s553_s14  ;;  %s3869_s20 = int_to_ptr.vmem [resolvable:$true] %s564_s20 }
  0xcd   : > { %p3396_p8 = pneg %p3865_p11 }
  0xcf   : > { %s3863_s15 = scalar_lea.hbm %s4542_s3, %s2762_s12  ;;  %s3399_s17 = scalar_lea.hbm %s4542_s3, 2048 }
  0xd0   : > { %s3394_s4 = scalar_lea.hbm %s3863_s15, 1024  ;;  %p3400_p13 = scmp.lt.u32.totalorder %s3863_s15, %s4542_s3 }
  0xd1   : > { %p3395_p12 = scmp.ne.s32.totalorder %s3863_s15, %s3394_s4  ;;  %p3401_p0 = scmp.lt.u32.totalorder %s3399_s17, %s3394_s4 }
  0xd2   : > { %p3403_p5 = scmp.lt.u32.totalorder %s3394_s4, %s3863_s15 }
  0xd3   : > { %p3397_p1 = pnand %p3396_p8, %p3395_p12  ;;  %p3402_p2 = por %p3401_p0, %p3400_p13 }
  0xd5   : > { %p3398_p3 = pneg %p3397_p1  ;;  %p3404_p9 = por %p3403_p5, %p3402_p2 }
  0xd7   : > { %p3405_p10 = pnand %p3404_p9, %p3398_p3 }
  0xd9   : > { %3408 = shalt.err (!%p3405_p10)
}
  0xda   : > { %s3409_s14 = scalar_lea.vmem %s3869_s20, 1024  ;;  %s3517_s23 = smov [#allocation3]  }
  0xdb   : > { %p3410_p12 = scmp.ne.s32.totalorder %s3869_s20, %s3409_s14  ;;  %s3414_s12 = sshll.u32 %s3517_s23, 4  ;;  %s3415_s12 = int_to_ptr.vmem [resolvable:$false] %s3414_s12 }
  0xdc   : > { %s3416_s9 = scalar_lea.vmem %s3415_s12, 2048  ;;  %p3417_p6 = scmp.lt.s32.totalorder %s3869_s20, %s3415_s12 }
  0xdd   : > { %p3412_p1 = pnand %p3410_p12, %p3396_p8  ;;  %p3418_p13 = scmp.lt.s32.totalorder %s3416_s9, %s3409_s14 }
  0xdf   : > { %p3413_p4 = pneg %p3412_p1  ;;  %p3419_p0 = por %p3418_p13, %p3417_p6 }
  0xe1   : > { %p3420_p2 = pnand %p3419_p0, %p3413_p4 }
  0xe3   : > { %3423 = shalt.err (!%p3420_p2)
}
  0xe4   : > { %s4544_s4 = smov 8   ;;  %s4545_s17 = smov 128  }
  0xe5   : > { %3129 = dma.hbm_to_vmem [thread:$0]  (!%p3865_p11), %s3863_s15, 1024, %s3869_s20, %s3871_s19, %s4545_s17, %s4545_s17, %s4544_s4  }
  0xe6   : > { %p4546_p8 = scmp.ne.s32.totalorder %s4533_s30, 0 }
  0xe7   : > { %s3905_s28 = sand.u32 (!%p4546_p8), 1, %s3498_s25  }
  0xe8   : > { %576 = sbr.rel (%p4546_p8) target bundleno = 2572 (0xa0c), region = 88  ;;  %s2669_s14 = sshll.u32 (!%p4546_p8), %s3905_s28, 6 }
  0xe9   : > { %s579_s23 = scalar_lea.sflag (!%p4546_p8), [#allocation4], %s3905_s28  ;;  %s3911_s1 = scalar_lea.vmem (!%p4546_p8), [#allocation3], %s2669_s14 }
  0xef   : > { %3469 = dma.done.wait (%p3845_p7), %s579_s23, 1024  }
  0xf0   : > { %3471 = vsyncadd (%p3845_p7), %s579_s23, 4294966272  ;;  %p4547_p6 = scmp.eq.s32.totalorder %s3637_s0, 0 }
  0xf2   : > { %3473 = dma.done.wait (%p4547_p6), [#allocation7], 896   ;;  %p4548_p4 = pmov %p4547_p6 }
  0xf4   : > { %3475 = vsyncadd (%p4548_p4), [#allocation7], 4294966400  ;;  %p4549_p11 = pmov %p4548_p4 }
  0xf5   : > { %p4550_p3 = pmov %p4548_p4 }
  0xf6   : > { %3477 = dma.done.wait (%p4549_p11), [#allocation10], 640  }
  0xf7   : > { %3479 = vsyncadd (%p4550_p3), [#allocation10], 4294966656  ;;  %p4551_p5 = pmov %p4550_p3 }
  0xf8   : > { %p4552_p9 = pmov %p4550_p3 }
  0xf9   : > { %3481 = dma.done.wait (%p4551_p5), [#allocation13], 896  }
  0xfa   : > { %3483 = vsyncadd (%p4552_p9), [#allocation13], 4294966400  ;;  %p4553_p7 = pmov %p4550_p3 }
  0xfb   : > { %p4554_p10 = pmov %p4550_p3 }
  0xfc   : > { %3485 = dma.done.wait (%p4553_p7), [#allocation16], 128  }
  0xfd   : > { %3487 = vsyncadd (%p4554_p10), [#allocation16], 4294967168  ;;  %vm808_vm0 = vcmask 64512   ;;  %v3518_v0 = vmov 0.0   ;;  %vm678_vm1 = vcmask 130048   ;;  %s4555_s19 = sld [smem:[#allocation25_spill]] }
  0xfe   : > { %809 = vst.msk [vmem:[#allocation2] sm:$0xff] %vm808_vm0, %v3518_v0  ;;  %812 = vst.msk [vmem:[#allocation2 + $0x10] sm:$0xff] %vm808_vm0, %v3518_v0  ;;  %v661_v3 = vld [vmem:[%s3911_s1] sm:$0xff]  ;;  %v662_v5 = vld [vmem:[%s3911_s1 + $0x8] sm:$0xff]  ;;  %vm810_vm2 = vcmask 58368   ;;  %s3519_s4 = smov 16  }
  0xff   : > { %814 = vst.msk [vmem:[#allocation2 + $0x20] sm:$0xff] %vm808_vm0, %v3518_v0  ;;  %816 = vst.msk [vmem:[#allocation2 + $0x30] sm:$0xff] %vm808_vm0, %v3518_v0  ;;  %2866 = vmatprep.mubr.msk.f32.mxu0 %vm678_vm1, %v661_v3  ;;  %v663_v6 = vld [vmem:[%s3911_s1 + $0x10] sm:$0xff]  ;;  %v664_v7 = vld [vmem:[%s3911_s1 + $0x18] sm:$0xff]  ;;  %s4521_s17 = smov 8   ;;  %s3521_s23 = smov 32  }
 0x100   : > { %818 = vst.msk [vmem:[#allocation2 + $0x40] sm:$0xff] %vm808_vm0, %v3518_v0  ;;  %820 = vst.msk [vmem:[#allocation2 + $0x50] sm:$0xff] %vm808_vm0, %v3518_v0  ;;  %v665_v8 = vld [vmem:[%s3911_s1 + $0x20] sm:$0xff]  ;;  %v666_v9 = vld [vmem:[%s3911_s1 + $0x28] sm:$0xff]  ;;  %s3523_s30 = smov 40   ;;  %vm1193_vm3 = vcmask 195584  }
 0x101   : > { %822 = vst.msk [vmem:[#allocation2 + $0x60] sm:$0xff] %vm808_vm0, %v3518_v0  ;;  %824 = vst.msk [vmem:[#allocation2 + $0x70] sm:$0xff] %vm808_vm0, %v3518_v0  ;;  %v667_v10 = vld [vmem:[%s3911_s1 + $0x30] sm:$0xff]  ;;  %v668_v11 = vld [vmem:[%s3911_s1 + $0x38] sm:$0xff]  ;;  %s3522_s1 = smov 24   ;;  %vm1202_vm4 = vcmask 261120  }
 0x102   : > { %826 = vst.msk [vmem:[#allocation2 + $0x80] sm:$0xff] %vm808_vm0, %v3518_v0  ;;  %v830_v12 = vld [vmem:[#allocation6] sm:$0xff]  ;;  %v1220_v32 = vld [vmem:[#allocation8] sm:$0xff]  ;;  %v1221_v33 = vld [vmem:[#allocation8 + $0x8] sm:$0xff]  ;;  %vm1211_vm5 = vcmask 326656   ;;  %vm1233_vm6 = vcmask 392192  }
 0x103   : > { %v669_v1 = vld [vmem:[%s4555_s19] sm:$0xff]  ;;  %v670_v2 = vld [vmem:[%s4555_s19 + $0x8] sm:$0xff]  ;;  %2878 = vmatprep.subr.mxu1 %v830_v12  ;;  %815 = vst.msk [vmem:[#allocation2 + $0x28] sm:$0x3] %vm810_vm2, %v3518_v0  ;;  %811 = vst.msk [vmem:[#allocation2 + $0x8] sm:$0x3] %vm810_vm2, %v3518_v0  ;;  %v3026_v34 = vpack.c.bf16 %v1221_v33, %v1220_v32 }
 0x104   : > { %v3022_v4 = vpack.c.bf16 %v670_v2, %v669_v1  ;;  %2879 = vmatpush3.msra.mxu1 %v830_v12  ;;  %813 = vst.msk [vmem:[#allocation2 + $0x18] sm:$0x3] %vm810_vm2, %v3518_v0  ;;  %817 = vst.msk [vmem:[#allocation2 + $0x38] sm:$0x3] %vm810_vm2, %v3518_v0  ;;  %v2678_v13 = vld [vmem:[%s4496_s2] ss:$0 sm:$0xff] }
 0x105   : > { %819 = vst.msk [vmem:[#allocation2 + $0x48] sm:$0x3] %vm810_vm2, %v3518_v0  ;;  %821 = vst.msk [vmem:[#allocation2 + $0x58] sm:$0x3] %vm810_vm2, %v3518_v0  ;;  %3066 = vmatprep.subr.bf16.mxu1 %v3026_v34  ;;  %v1222_v38 = vld [vmem:[#allocation8 + $0x10] sm:$0xff]  ;;  %v1223_v39 = vld [vmem:[#allocation8 + $0x18] sm:$0xff] }
 0x106   : > { %3023 = vmatprep.subr.bf16.mxu0 %v3022_v4  ;;  %823 = vst.msk [vmem:[#allocation2 + $0x68] sm:$0x3] %vm810_vm2, %v3518_v0  ;;  %825 = vst.msk [vmem:[#allocation2 + $0x78] sm:$0x3] %vm810_vm2, %v3518_v0  ;;  %v3030_v41 = vpack.c.bf16 %v1223_v39, %v1222_v38  ;;  %v1224_v46 = vld [vmem:[#allocation8 + $0x20] sm:$0xff]  ;;  %v1225_v47 = vld [vmem:[#allocation8 + $0x28] sm:$0xff] }
 0x107   : > { %3025 = vmatpush3.bf16.msra.mxu0 %v3022_v4  ;;  %827 = vst.msk [vmem:[#allocation2 + $0x88] sm:$0x3] %vm810_vm2, %v3518_v0  ;;  %v3034_v48 = vpack.c.bf16 %v1225_v47, %v1224_v46  ;;  %s4556_s22 = sld [smem:[#allocation28_spill]]  ;;  %s4558_s20 = sld [smem:[#allocation29_spill]] }
 0x108   : > { %3027 = vmatprep.subr.bf16.mxu0 %v3026_v34  ;;  %s4559_s9 = sld [smem:[#allocation30_spill]]  ;;  %p4562_p1 = scmp.ne.s32.totalorder %s4540_s16, 0 }
 0x10a   : > { %2867 = vmatmul.mubr.msk.f32.vlgmr.msra.gmra.mrb[0].mxu0 %vm678_vm1, %v662_v5  ;;  %v3999_v30 = vld [vmem:[#allocation2 + $0x2] sm:$0xff] }
 0x10b   : > { %2869 = vmatprep.mubr.msk.f32.mxu0 %vm678_vm1, %v663_v6  ;;  %v4001_v31 = vld [vmem:[#allocation2 + $0x1] sm:$0xff]  ;;  %1057 = vrot.lane.b32.xlu1 %v3999_v30, %s3519_s4 }
 0x10c   : > { %1025 = vrot.lane.b32.xlu0 %v4001_v31, %s4521_s17  ;;  %3029 = vmatpush3.bf16.msra.mxu0 %v3026_v34 }
 0x10d   : > { %3031 = vmatprep.subr.bf16.mxu0 %v3030_v41 }
 0x10e   : > { %2870 = vmatmul.mubr.msk.f32.gmra.mrb[2].mxu0 %vm678_vm1, %v664_v7  ;;  %v1371_v7 = vld [vmem:[#allocation9] sm:$0xff] }
 0x10f   : > { %2872 = vmatprep.mubr.msk.f32.mxu0 %vm678_vm1, %v665_v8 }
 0x110   : > { %3033 = vmatpush3.bf16.msra.mxu0 %v3030_v41 }
 0x111   : > { %3035 = vmatprep.subr.bf16.mxu0 %v3034_v48 }
 0x112   : > { %2873 = vmatmul.mubr.msk.f32.gmra.mrb[4].mxu0 %vm678_vm1, %v666_v9 }
 0x113   : > { %2875 = vmatprep.mubr.msk.f32.mxu0 %vm678_vm1, %v667_v10 }
 0x114   : > { %3037 = vmatpush3.bf16.msra.mxu0 %v3034_v48 }
 0x115   : > { %2916 = vmatprep.subr.mxu0 %v1371_v7 }
 0x116   : > { %2876 = vmatmul.mubr.msk.f32.gmra.mrb[6].mxu0 %vm678_vm1, %v668_v11 }
 0x17d   : > { %v1058_v10 = vpop.permute.xlu1 %1057 }
 0x17e   : > { %v1026_v11 = vpop.permute.xlu0 %1025 }
 0x1dd   : > { %v2868_v14 = vpop.f32.mrb[0].mxu0 }
 0x1de   : > { %v769_v15 = vpop.f32.mrb[1].mxu0  ;;  %v3969_v17 = vadd.f32 %v2868_v14, %v2678_v13 }
 0x1df   : > { %v3967_v16 = vadd.f32 %v2678_v13, %v769_v15 }
 0x1e1   : > { %2880 = vmatprep.mubr.msk.f32.mxu1 %vm808_vm0, %v3967_v16  ;;  %v2871_v18 = vpop.f32.mrb[2].mxu0 }
 0x1e2   : > { %2881 = vmatmul.mubr.msk.f32.vlgmr.msra.gmra.mrb[0].mxu1 %vm808_vm0, %v3969_v17  ;;  %v3975_v19 = vadd.f32 %v2871_v18, %v2678_v13  ;;  %v779_v20 = vpop.f32.mrb[3].mxu0 }
 0x1e3   : > { %v3977_v21 = vadd.f32 %v2678_v13, %v779_v20  ;;  %3069 = vmatpush3.bf16.msra.mxu1 %v3026_v34 }
 0x1e4   : > { %3067 = vmatprep.subr.bf16.mxu1 %v3030_v41 }
 0x1e5   : > { %2883 = vmatprep.mubr.msk.f32.mxu1 %vm808_vm0, %v3977_v21  ;;  %v2874_v22 = vpop.f32.mrb[4].mxu0 }
 0x1e6   : > { %2884 = vmatmul.mubr.msk.f32.gmra.mrb[2].mxu1 %vm808_vm0, %v3975_v19  ;;  %v3983_v23 = vadd.f32 %v2874_v22, %v2678_v13  ;;  %v789_v24 = vpop.f32.mrb[5].mxu0  ;;  %v4078_v22 = vld [vmem:[#allocation2] sm:$0xff] }
 0x1e7   : > { %v3985_v25 = vadd.f32 %v2678_v13, %v789_v24  ;;  %3070 = vmatpush3.bf16.msra.mxu1 %v3030_v41  ;;  %v1177_v24 = vsel %vm808_vm0, %v4078_v22, %v1026_v11 }
 0x1e8   : > { %3068 = vmatprep.subr.bf16.mxu1 %v3034_v48  ;;  %v1185_v33 = vsel %vm678_vm1, %v1177_v24, %v1058_v10 }
 0x1e9   : > { %2886 = vmatprep.mubr.msk.f32.mxu1 %vm808_vm0, %v3985_v25  ;;  %v2877_v26 = vpop.f32.mrb[6].mxu0 }
 0x1ea   : > { %2887 = vmatmul.mubr.msk.f32.gmra.mrb[4].mxu1 %vm808_vm0, %v3983_v23  ;;  %v3991_v27 = vadd.f32 %v2877_v26, %v2678_v13  ;;  %v799_v28 = vpop.f32.mrb[7].mxu0 }
 0x1eb   : > { %v3993_v29 = vadd.f32 %v2678_v13, %v799_v28  ;;  %3071 = vmatpush3.bf16.msra.mxu1 %v3034_v48 }
 0x1ed   : > { %2889 = vmatprep.mubr.msk.f32.mxu1 %vm808_vm0, %v3993_v29 }
 0x1ee   : > { %2890 = vmatmul.mubr.msk.f32.gmra.mrb[6].mxu1 %vm808_vm0, %v3991_v27 }
 0x2b5   : > { %v2882_v35 = vpop.f32.mrb[0].mxu1 }
 0x2b6   : > { %962 = vst.msk [vmem:[#allocation2 + $0x21] sm:$0xff] %vm808_vm0, %v2882_v35  ;;  %v921_v36 = vpop.f32.mrb[1].mxu1 }
 0x2b7   : > { %961 = vst.msk [vmem:[#allocation2 + $0x11] sm:$0xff] %vm808_vm0, %v921_v36 }
 0x2b9   : > { %v2885_v37 = vpop.f32.mrb[2].mxu1 }
 0x2ba   : > { %964 = vst.msk [vmem:[#allocation2 + $0x41] sm:$0xff] %vm808_vm0, %v2885_v37  ;;  %v931_v40 = vpop.f32.mrb[3].mxu1 }
 0x2bb   : > { %963 = vst.msk [vmem:[#allocation2 + $0x31] sm:$0xff] %vm808_vm0, %v931_v40 }
 0x2bd   : > { %v1002_v42 = vld [vmem:[#allocation2 + $0x21] sm:$0xff]  ;;  %v2888_v44 = vpop.f32.mrb[4].mxu1 }
 0x2be   : > { %v4011_v43 = vld [vmem:[#allocation2 + $0x20] sm:$0xff]  ;;  %1123 = vrot.lane.b32.xlu0 %v1002_v42, %s3521_s23  ;;  %966 = vst.msk [vmem:[#allocation2 + $0x61] sm:$0xff] %vm808_vm0, %v2888_v44  ;;  %v941_v45 = vpop.f32.mrb[5].mxu1  ;;  %v978_v52 = vld [vmem:[#allocation2 + $0x11] sm:$0xff] }
 0x2bf   : > { %1091 = vrot.lane.b32.xlu1 %v4011_v43, %s3522_s1  ;;  %965 = vst.msk [vmem:[#allocation2 + $0x51] sm:$0xff] %vm808_vm0, %v941_v45  ;;  %v1010_v49 = vld [vmem:[#allocation2 + $0x22] sm:$0xff]  ;;  %v986_v53 = vld [vmem:[#allocation2 + $0x12] sm:$0xff] }
 0x2c0   : > { %v4024_v54 = vld [vmem:[#allocation2 + $0x10] sm:$0xff] }
 0x2c1   : > { %v2891_v50 = vpop.f32.mrb[6].mxu1  ;;  %v1004_v55 = vld [vmem:[#allocation2 + $0x41] sm:$0xff] }
 0x2c2   : > { %1155 = vrot.lane.b32.xlu0 %v1010_v49, %s3523_s30  ;;  %968 = vst.msk [vmem:[#allocation2 + $0x81] sm:$0xff] %vm808_vm0, %v2891_v50  ;;  %v951_v51 = vpop.f32.mrb[7].mxu1  ;;  %v4031_v56 = vld [vmem:[#allocation2 + $0x40] sm:$0xff]  ;;  %v980_v58 = vld [vmem:[#allocation2 + $0x31] sm:$0xff] }
 0x2c3   : > { %1029 = vrot.lane.b32.xlu1 %v1002_v42, %s4521_s17  ;;  %967 = vst.msk [vmem:[#allocation2 + $0x71] sm:$0xff] %vm808_vm0, %v951_v51  ;;  %v1012_v57 = vld [vmem:[#allocation2 + $0x42] sm:$0xff]  ;;  %v988_v59 = vld [vmem:[#allocation2 + $0x32] sm:$0xff] }
 0x2c4   : > { %v4040_v60 = vld [vmem:[#allocation2 + $0x30] sm:$0xff] }
 0x2c5   : > { %v1006_v61 = vld [vmem:[#allocation2 + $0x61] sm:$0xff] }
 0x2c6   : > { %1027 = vrot.lane.b32.xlu0 %v978_v52, %s4521_s17  ;;  %v4047_v62 = vld [vmem:[#allocation2 + $0x60] sm:$0xff]  ;;  %v982_v0 = vld [vmem:[#allocation2 + $0x51] sm:$0xff] }
 0x2c7   : > { %1061 = vrot.lane.b32.xlu1 %v1010_v49, %s3519_s4  ;;  %v1014_v63 = vld [vmem:[#allocation2 + $0x62] sm:$0xff]  ;;  %v990_v1 = vld [vmem:[#allocation2 + $0x52] sm:$0xff] }
 0x2c8   : > { %v4056_v2 = vld [vmem:[#allocation2 + $0x50] sm:$0xff] }
 0x2c9   : > { %v1000_v3 = vld [vmem:[#allocation2 + $0x80] sm:$0xff] }
 0x2ca   : > { %1089 = vrot.lane.b32.xlu0 %v4024_v54, %s3522_s1  ;;  %v984_v4 = vld [vmem:[#allocation2 + $0x71] sm:$0xff]  ;;  %v1008_v5 = vld [vmem:[#allocation2 + $0x81] sm:$0xff] }
 0x2cb   : > { %1059 = vrot.lane.b32.xlu1 %v986_v53, %s3519_s4  ;;  %v4065_v6 = vld [vmem:[#allocation2 + $0x70] sm:$0xff]  ;;  %v1016_v9 = vld [vmem:[#allocation2 + $0x82] sm:$0xff] }
 0x2cc   : > { %v992_v8 = vld [vmem:[#allocation2 + $0x72] sm:$0xff] }
 0x2ce   : > { %1121 = vrot.lane.b32.xlu0 %v978_v52, %s3521_s23 }
 0x2cf   : > { %1153 = vrot.lane.b32.xlu1 %v986_v53, %s3523_s30 }
 0x2d2   : > { %1127 = vrot.lane.b32.xlu0 %v1004_v55, %s3521_s23 }
 0x2d3   : > { %1095 = vrot.lane.b32.xlu1 %v4031_v56, %s3522_s1 }
 0x2d6   : > { %1159 = vrot.lane.b32.xlu0 %v1012_v57, %s3523_s30 }
 0x2d7   : > { %1033 = vrot.lane.b32.xlu1 %v1004_v55, %s4521_s17 }
 0x2da   : > { %1031 = vrot.lane.b32.xlu0 %v980_v58, %s4521_s17 }
 0x2db   : > { %1065 = vrot.lane.b32.xlu1 %v1012_v57, %s3519_s4 }
 0x2de   : > { %1093 = vrot.lane.b32.xlu0 %v4040_v60, %s3522_s1 }
 0x2df   : > { %1063 = vrot.lane.b32.xlu1 %v988_v59, %s3519_s4 }
 0x2e2   : > { %1125 = vrot.lane.b32.xlu0 %v980_v58, %s3521_s23 }
 0x2e3   : > { %1157 = vrot.lane.b32.xlu1 %v988_v59, %s3523_s30 }
 0x2e6   : > { %1131 = vrot.lane.b32.xlu0 %v1006_v61, %s3521_s23 }
 0x2e7   : > { %1099 = vrot.lane.b32.xlu1 %v4047_v62, %s3522_s1 }
 0x2ea   : > { %1163 = vrot.lane.b32.xlu0 %v1014_v63, %s3523_s30 }
 0x2eb   : > { %1037 = vrot.lane.b32.xlu1 %v1006_v61, %s4521_s17 }
 0x2ee   : > { %1035 = vrot.lane.b32.xlu0 %v982_v0, %s4521_s17 }
 0x2ef   : > { %1069 = vrot.lane.b32.xlu1 %v1014_v63, %s3519_s4 }
 0x2f2   : > { %1097 = vrot.lane.b32.xlu0 %v4056_v2, %s3522_s1 }
 0x2f3   : > { %1067 = vrot.lane.b32.xlu1 %v990_v1, %s3519_s4 }
 0x2f6   : > { %1129 = vrot.lane.b32.xlu0 %v982_v0, %s3521_s23 }
 0x2f7   : > { %1161 = vrot.lane.b32.xlu1 %v990_v1, %s3523_s30 }
 0x2fa   : > { %1039 = vrot.lane.b32.xlu0 %v984_v4, %s4521_s17 }
 0x2fb   : > { %1103 = vrot.lane.b32.xlu1 %v1000_v3, %s3522_s1 }
 0x2fe   : > { %1101 = vrot.lane.b32.xlu0 %v4065_v6, %s3522_s1 }
 0x2ff   : > { %1135 = vrot.lane.b32.xlu1 %v1008_v5, %s3521_s23 }
 0x302   : > { %1133 = vrot.lane.b32.xlu0 %v984_v4, %s3521_s23 }
 0x303   : > { %1071 = vrot.lane.b32.xlu1 %v992_v8, %s3519_s4 }
 0x306   : > { %1165 = vrot.lane.b32.xlu0 %v992_v8, %s3523_s30 }
 0x307   : > { %1167 = vrot.lane.b32.xlu1 %v1016_v9, %s3523_s30 }
 0x30a   : > { %1858 = vrot.lane.b32.xlu0 %v4001_v31, %s4521_s17 }
 0x30e   : > { %1890 = vrot.lane.b32.xlu0 %v3999_v30, %s3519_s4 }
 0x330   : > { %v1124_v12 = vpop.permute.xlu0 %1123 }
 0x331   : > { %v1092_v13 = vpop.permute.xlu1 %1091 }
 0x334   : > { %v1156_v14 = vpop.permute.xlu0 %1155 }
 0x335   : > { %v1030_v15 = vpop.permute.xlu1 %1029 }
 0x336   : > { %v1179_v52 = vsel %vm808_vm0, %v4011_v43, %v1030_v15 }
 0x338   : > { %v1028_v20 = vpop.permute.xlu0 %1027 }
 0x339   : > { %v1062_v18 = vpop.permute.xlu1 %1061  ;;  %v1178_v26 = vsel %vm808_vm0, %v4024_v54, %v1028_v20 }
 0x33a   : > { %v1187_v54 = vsel %vm678_vm1, %v1179_v52, %v1062_v18 }
 0x33c   : > { %v1090_v31 = vpop.permute.xlu0 %1089 }
 0x33d   : > { %v1060_v28 = vpop.permute.xlu1 %1059  ;;  %v1194_v35 = vsel %vm1193_vm3, %v1185_v33, %v1090_v31 }
 0x33e   : > { %v1186_v30 = vsel %vm678_vm1, %v1178_v26, %v1060_v28 }
 0x33f   : > { %v1195_v32 = vsel %vm1193_vm3, %v1186_v30, %v1092_v13 }
 0x340   : > { %v1204_v34 = vsel %vm1202_vm4, %v1195_v32, %v1124_v12  ;;  %v1122_v37 = vpop.permute.xlu0 %1121 }
 0x341   : > { %v1154_v36 = vpop.permute.xlu1 %1153  ;;  %v1203_v38 = vsel %vm1202_vm4, %v1194_v35, %v1122_v37  ;;  %v1213_v40 = vsel %vm1211_vm5, %v1204_v34, %v1156_v14 }
 0x342   : > { %v1212_v39 = vsel %vm1211_vm5, %v1203_v38, %v1154_v36 }
 0x343   : > { %2904 = vmatprep.mubr.msk.f32.mxu0 %vm1233_vm6, %v1212_v39 }
 0x344   : > { %2905 = vmatmul.mubr.msk.f32.vlgmr.msra.gmra.mrb[8].mxu0 %vm1233_vm6, %v1213_v40  ;;  %v1128_v41 = vpop.permute.xlu0 %1127 }
 0x345   : > { %v1096_v42 = vpop.permute.xlu1 %1095  ;;  %2917 = vmatpush3.msra.mxu0 %v1371_v7 }
 0x348   : > { %v1160_v44 = vpop.permute.xlu0 %1159 }
 0x349   : > { %v1034_v45 = vpop.permute.xlu1 %1033 }
 0x34a   : > { %v1181_v11 = vsel %vm808_vm0, %v4031_v56, %v1034_v45 }
 0x34c   : > { %v1032_v47 = vpop.permute.xlu0 %1031 }
 0x34d   : > { %v1066_v46 = vpop.permute.xlu1 %1065  ;;  %v1180_v48 = vsel %vm808_vm0, %v4040_v60, %v1032_v47 }
 0x34e   : > { %v1189_v13 = vsel %vm678_vm1, %v1181_v11, %v1066_v46  ;;  %v1517_v46 = vld [vmem:[#allocation11 + $0x8] sm:$0xff] }
 0x350   : > { %v1094_v50 = vpop.permute.xlu0 %1093 }
 0x351   : > { %v1064_v49 = vpop.permute.xlu1 %1063  ;;  %v1196_v55 = vsel %vm1193_vm3, %v1187_v54, %v1094_v50 }
 0x352   : > { %v1188_v51 = vsel %vm678_vm1, %v1180_v48, %v1064_v49  ;;  %v2695_v48 = vld [vmem:[%s4499_s5] ss:$0 sm:$0xff] }
 0x353   : > { %v1197_v53 = vsel %vm1193_vm3, %v1188_v51, %v1096_v42 }
 0x354   : > { %v1126_v58 = vpop.permute.xlu0 %1125  ;;  %v1206_v59 = vsel %vm1202_vm4, %v1197_v53, %v1128_v41 }
 0x355   : > { %v1158_v57 = vpop.permute.xlu1 %1157  ;;  %v1205_v61 = vsel %vm1202_vm4, %v1196_v55, %v1126_v58  ;;  %v1215_v63 = vsel %vm1211_vm5, %v1206_v59, %v1160_v44 }
 0x356   : > { %v1214_v60 = vsel %vm1211_vm5, %v1205_v61, %v1158_v57 }
 0x357   : > { %2907 = vmatprep.mubr.msk.f32.mxu0 %vm1233_vm6, %v1214_v60 }
 0x358   : > { %2908 = vmatmul.mubr.msk.f32.gmra.mrb[10].mxu0 %vm1233_vm6, %v1215_v63  ;;  %v1132_v43 = vpop.permute.xlu0 %1131 }
 0x359   : > { %v1100_v0 = vpop.permute.xlu1 %1099 }
 0x35c   : > { %v1164_v1 = vpop.permute.xlu0 %1163 }
 0x35d   : > { %v1038_v3 = vpop.permute.xlu1 %1037 }
 0x35e   : > { %v1183_v35 = vsel %vm808_vm0, %v4047_v62, %v1038_v3  ;;  %v1516_v62 = vld [vmem:[#allocation11] sm:$0xff] }
 0x35f   : > { %v3038_v47 = vpack.c.bf16 %v1517_v46, %v1516_v62 }
 0x360   : > { %v1036_v5 = vpop.permute.xlu0 %1035 }
 0x361   : > { %v1070_v4 = vpop.permute.xlu1 %1069  ;;  %v1182_v7 = vsel %vm808_vm0, %v4056_v2, %v1036_v5  ;;  %3039 = vmatprep.subr.bf16.mxu1 %v3038_v47 }
 0x362   : > { %v1191_v37 = vsel %vm678_vm1, %v1183_v35, %v1070_v4 }
 0x364   : > { %v1098_v9 = vpop.permute.xlu0 %1097 }
 0x365   : > { %v1068_v8 = vpop.permute.xlu1 %1067  ;;  %v1198_v15 = vsel %vm1193_vm3, %v1189_v13, %v1098_v9  ;;  %v1664_v9 = vld [vmem:[#allocation12] sm:$0xff] }
 0x366   : > { %v1190_v10 = vsel %vm678_vm1, %v1182_v7, %v1068_v8  ;;  %2950 = vmatprep.subr.mxu0 %v1664_v9 }
 0x367   : > { %v1199_v12 = vsel %vm1193_vm3, %v1190_v10, %v1100_v0 }
 0x368   : > { %v1208_v14 = vsel %vm1202_vm4, %v1199_v12, %v1132_v43  ;;  %v1130_v20 = vpop.permute.xlu0 %1129 }
 0x369   : > { %v1162_v18 = vpop.permute.xlu1 %1161  ;;  %v1207_v24 = vsel %vm1202_vm4, %v1198_v15, %v1130_v20  ;;  %v1217_v26 = vsel %vm1211_vm5, %v1208_v14, %v1164_v1 }
 0x36a   : > { %v1216_v2 = vsel %vm1211_vm5, %v1207_v24, %v1162_v18 }
 0x36b   : > { %2910 = vmatprep.mubr.msk.f32.mxu1 %vm1233_vm6, %v1216_v2 }
 0x36c   : > { %2911 = vmatmul.mubr.msk.f32.vlgmr.msra.gmra.mrb[8].mxu1 %vm1233_vm6, %v1217_v26  ;;  %v1040_v28 = vpop.permute.xlu0 %1039 }
 0x36d   : > { %v1104_v56 = vpop.permute.xlu1 %1103  ;;  %v1184_v32 = vsel %vm808_vm0, %v4065_v6, %v1040_v28  ;;  %3041 = vmatpush3.bf16.msra.mxu1 %v3038_v47 }
 0x370   : > { %v1102_v30 = vpop.permute.xlu0 %1101 }
 0x371   : > { %v1136_v31 = vpop.permute.xlu1 %1135  ;;  %v1200_v39 = vsel %vm1193_vm3, %v1191_v37, %v1102_v30 }
 0x374   : > { %v1134_v34 = vpop.permute.xlu0 %1133 }
 0x375   : > { %v1072_v33 = vpop.permute.xlu1 %1071  ;;  %v1209_v41 = vsel %vm1202_vm4, %v1200_v39, %v1134_v34 }
 0x376   : > { %v1192_v36 = vsel %vm678_vm1, %v1184_v32, %v1072_v33 }
 0x377   : > { %v1201_v38 = vsel %vm1193_vm3, %v1192_v36, %v1104_v56 }
 0x378   : > { %v1210_v40 = vsel %vm1202_vm4, %v1201_v38, %v1136_v31  ;;  %v1166_v44 = vpop.permute.xlu0 %1165 }
 0x379   : > { %v1168_v42 = vpop.permute.xlu1 %1167  ;;  %v1218_v45 = vsel %vm1211_vm5, %v1209_v41, %v1166_v44 }
 0x37a   : > { %v1219_v6 = vsel %vm1211_vm5, %v1210_v40, %v1168_v42  ;;  %2913 = vmatprep.mubr.msk.f32.mxu1 %vm1233_vm6, %v1218_v45  ;;  %v2713_v40 = vld [vmem:[%s4556_s22] ss:$0 sm:$0xff] }
 0x37b   : > { %2914 = vmatmul.mubr.msk.f32.gmra.mrb[10].mxu1 %vm1233_vm6, %v1219_v6 }
 0x417   : > { %v2906_v49 = vpop.f32.mrb[8].mxu0 }
 0x418   : > { %v1330_v50 = vadd.f32 %v2906_v49, %v2695_v48  ;;  %v1324_v51 = vpop.f32.mrb[9].mxu0 }
 0x419   : > { %v1325_v52 = vadd.f32 %v2695_v48, %v1324_v51 }
 0x41a   : > { %v4143_v54 = vadd.f32 %v1330_v50, %v3969_v17 }
 0x41b   : > { %v4140_v53 = vadd.f32 %v1325_v52, %v3967_v16 }
 0x41d   : > { %2918 = vmatprep.mubr.msk.f32.mxu0 %vm808_vm0, %v4140_v53 }
 0x41e   : > { %2919 = vmatmul.mubr.msk.f32.vlgmr.msra.gmra.mrb[12].mxu0 %vm808_vm0, %v4143_v54 }
 0x41f   : > { %2951 = vmatpush3.msra.mxu0 %v1664_v9 }
 0x42b   : > { %v2909_v55 = vpop.f32.mrb[10].mxu0 }
 0x42c   : > { %v1340_v57 = vadd.f32 %v2909_v55, %v2695_v48  ;;  %v1334_v58 = vpop.f32.mrb[11].mxu0 }
 0x42d   : > { %v1335_v59 = vadd.f32 %v2695_v48, %v1334_v58 }
 0x42e   : > { %v4153_v60 = vadd.f32 %v1340_v57, %v3975_v19 }
 0x42f   : > { %v4150_v61 = vadd.f32 %v1335_v59, %v3977_v21 }
 0x431   : > { %2921 = vmatprep.mubr.msk.f32.mxu0 %vm808_vm0, %v4150_v61 }
 0x432   : > { %2922 = vmatmul.mubr.msk.f32.gmra.mrb[14].mxu0 %vm808_vm0, %v4153_v60 }
 0x43f   : > { %v2912_v16 = vpop.f32.mrb[8].mxu1 }
 0x440   : > { %v1350_v17 = vadd.f32 %v2912_v16, %v2695_v48  ;;  %v1344_v63 = vpop.f32.mrb[9].mxu1 }
 0x441   : > { %v1345_v43 = vadd.f32 %v2695_v48, %v1344_v63 }
 0x442   : > { %v4163_v1 = vadd.f32 %v1350_v17, %v3983_v23  ;;  %v1518_v23 = vld [vmem:[#allocation11 + $0x10] sm:$0xff] }
 0x443   : > { %v4160_v0 = vadd.f32 %v1345_v43, %v3985_v25  ;;  %v1519_v25 = vld [vmem:[#allocation11 + $0x18] sm:$0xff] }
 0x444   : > { %v3042_v8 = vpack.c.bf16 %v1519_v25, %v1518_v23  ;;  %v2054_v25 = vld [vmem:[#allocation14 + $0x20] sm:$0xff] }
 0x445   : > { %2924 = vmatprep.mubr.msk.f32.mxu0 %vm808_vm0, %v4160_v0 }
 0x446   : > { %2925 = vmatmul.mubr.msk.f32.gmra.mrb[16].mxu0 %vm808_vm0, %v4163_v1  ;;  %3043 = vmatprep.subr.bf16.mxu1 %v3042_v8 }
 0x447   : > { %3045 = vmatpush3.bf16.msra.mxu1 %v3042_v8  ;;  %v2055_v8 = vld [vmem:[#allocation14 + $0x28] sm:$0xff] }
 0x44e   : > { %v2915_v19 = vpop.f32.mrb[10].mxu1 }
 0x44f   : > { %v1360_v21 = vadd.f32 %v2915_v19, %v2695_v48  ;;  %v1354_v3 = vpop.f32.mrb[11].mxu1  ;;  %v2051_v19 = vld [vmem:[#allocation14 + $0x8] sm:$0xff] }
 0x450   : > { %v1355_v4 = vadd.f32 %v2695_v48, %v1354_v3  ;;  %v2052_v3 = vld [vmem:[#allocation14 + $0x10] sm:$0xff] }
 0x451   : > { %v4173_v7 = vadd.f32 %v1360_v21, %v3991_v27 }
 0x452   : > { %v4170_v5 = vadd.f32 %v1355_v4, %v3993_v29  ;;  %v2704_v29 = vld [vmem:[%s4501_s7] ss:$0 sm:$0xff] }
 0x453   : > { %v2053_v4 = vld [vmem:[#allocation14 + $0x18] sm:$0xff] }
 0x454   : > { %2927 = vmatprep.mubr.msk.f32.mxu0 %vm808_vm0, %v4170_v5  ;;  %v3050_v23 = vpack.c.bf16 %v2053_v4, %v2052_v3 }
 0x455   : > { %2928 = vmatmul.mubr.msk.f32.gmra.mrb[18].mxu0 %vm808_vm0, %v4173_v7 }
 0x4f1   : > { %v2920_v27 = vpop.f32.mrb[12].mxu0 }
 0x4f2   : > { %v1475_v10 = vadd.f32 %v2920_v27, %v2704_v29  ;;  %v1469_v11 = vpop.f32.mrb[13].mxu0 }
 0x4f3   : > { %v1470_v12 = vadd.f32 %v2704_v29, %v1469_v11 }
 0x4f4   : > { %v1509_v14 = vmax.f32 %v1475_v10, 0.0 }
 0x4f5   : > { %v1508_v13 = vmax.f32 %v1470_v12, 0.0 }
 0x4f7   : > { %2938 = vmatprep.mubr.msk.f32.mxu1 %vm1202_vm4, %v1508_v13 }
 0x4f8   : > { %2939 = vmatmul.mubr.msk.f32.vlgmr.msra.gmra.mrb[12].mxu1 %vm1202_vm4, %v1509_v14 }
 0x505   : > { %v2923_v15 = vpop.f32.mrb[14].mxu0 }
 0x506   : > { %v1485_v18 = vadd.f32 %v2923_v15, %v2704_v29  ;;  %v1479_v20 = vpop.f32.mrb[15].mxu0 }
 0x507   : > { %v1480_v24 = vadd.f32 %v2704_v29, %v1479_v20 }
 0x508   : > { %v1511_v26 = vmax.f32 %v1485_v18, 0.0 }
 0x509   : > { %v1510_v2 = vmax.f32 %v1480_v24, 0.0 }
 0x50b   : > { %2941 = vmatprep.mubr.msk.f32.mxu1 %vm1202_vm4, %v1510_v2 }
 0x50c   : > { %2942 = vmatmul.mubr.msk.f32.gmra.mrb[14].mxu1 %vm1202_vm4, %v1511_v26 }
 0x519   : > { %v2926_v56 = vpop.f32.mrb[16].mxu0 }
 0x51a   : > { %v1495_v28 = vadd.f32 %v2926_v56, %v2704_v29  ;;  %v1489_v31 = vpop.f32.mrb[17].mxu0 }
 0x51b   : > { %v1490_v30 = vadd.f32 %v2704_v29, %v1489_v31 }
 0x51c   : > { %v1513_v33 = vmax.f32 %v1495_v28, 0.0 }
 0x51d   : > { %v1512_v32 = vmax.f32 %v1490_v30, 0.0 }
 0x51f   : > { %2944 = vmatprep.mubr.msk.f32.mxu1 %vm1202_vm4, %v1512_v32 }
 0x520   : > { %2945 = vmatmul.mubr.msk.f32.gmra.mrb[16].mxu1 %vm1202_vm4, %v1513_v33 }
 0x528   : > { %v2929_v34 = vpop.f32.mrb[18].mxu0 }
 0x529   : > { %v1505_v35 = vadd.f32 %v2929_v34, %v2704_v29  ;;  %v1499_v36 = vpop.f32.mrb[19].mxu0 }
 0x52a   : > { %v1500_v37 = vadd.f32 %v2704_v29, %v1499_v36  ;;  %v3054_v29 = vpack.c.bf16 %v2055_v8, %v2054_v25 }
 0x52b   : > { %v1515_v39 = vmax.f32 %v1505_v35, 0.0 }
 0x52c   : > { %v1514_v38 = vmax.f32 %v1500_v37, 0.0 }
 0x52e   : > { %2947 = vmatprep.mubr.msk.f32.mxu1 %vm1202_vm4, %v1514_v38 }
 0x52f   : > { %2948 = vmatmul.mubr.msk.f32.gmra.mrb[18].mxu1 %vm1202_vm4, %v1515_v39 }
 0x5cb   : > { %v2940_v41 = vpop.f32.mrb[12].mxu1 }
 0x5cc   : > { %v1623_v42 = vadd.f32 %v2940_v41, %v2713_v40  ;;  %v1617_v44 = vpop.f32.mrb[13].mxu1 }
 0x5cd   : > { %v1618_v6 = vadd.f32 %v2713_v40, %v1617_v44  ;;  %v1859_v44 = vpop.permute.xlu0 %1858 }
 0x5ce   : > { %v4197_v62 = vadd.f32 %v1623_v42, %v4143_v54 }
 0x5cf   : > { %v4194_v45 = vadd.f32 %v1618_v6, %v4140_v53 }
 0x5d1   : > { %2952 = vmatprep.mubr.msk.f32.mxu0 %vm808_vm0, %v4194_v45  ;;  %v1891_v6 = vpop.permute.xlu0 %1890 }
 0x5d2   : > { %2953 = vmatmul.mubr.msk.f32.vlgmr.msra.gmra.mrb[20].mxu0 %vm808_vm0, %v4197_v62 }
 0x5df   : > { %v2943_v46 = vpop.f32.mrb[14].mxu1 }
 0x5e0   : > { %v1633_v47 = vadd.f32 %v2943_v46, %v2713_v40  ;;  %v1627_v48 = vpop.f32.mrb[15].mxu1 }
 0x5e1   : > { %v1628_v49 = vadd.f32 %v2713_v40, %v1627_v48 }
 0x5e2   : > { %v4207_v51 = vadd.f32 %v1633_v47, %v4153_v60 }
 0x5e3   : > { %v4204_v50 = vadd.f32 %v1628_v49, %v4150_v61 }
 0x5e5   : > { %2955 = vmatprep.mubr.msk.f32.mxu0 %vm808_vm0, %v4204_v50 }
 0x5e6   : > { %2956 = vmatmul.mubr.msk.f32.gmra.mrb[22].mxu0 %vm808_vm0, %v4207_v51 }
 0x5f3   : > { %v2946_v52 = vpop.f32.mrb[16].mxu1 }
 0x5f4   : > { %v1643_v53 = vadd.f32 %v2946_v52, %v2713_v40  ;;  %v1637_v54 = vpop.f32.mrb[17].mxu1 }
 0x5f5   : > { %v1638_v55 = vadd.f32 %v2713_v40, %v1637_v54 }
 0x5f6   : > { %v4217_v58 = vadd.f32 %v1643_v53, %v4163_v1  ;;  %v2050_v1 = vld [vmem:[#allocation14] sm:$0xff] }
 0x5f7   : > { %v4214_v57 = vadd.f32 %v1638_v55, %v4160_v0  ;;  %v3046_v21 = vpack.c.bf16 %v2051_v19, %v2050_v1  ;;  %v2010_v55 = vsel %vm808_vm0, %v4078_v22, %v1859_v44 }
 0x5f9   : > { %2958 = vmatprep.mubr.msk.f32.mxu0 %vm808_vm0, %v4214_v57  ;;  %3047 = vmatprep.subr.bf16.mxu1 %v3046_v21 }
 0x5fa   : > { %2959 = vmatmul.mubr.msk.f32.gmra.mrb[24].mxu0 %vm808_vm0, %v4217_v58  ;;  %3049 = vmatpush3.bf16.msra.mxu1 %v3046_v21 }
 0x5fb   : > { %3051 = vmatprep.subr.bf16.mxu1 %v3050_v23 }
 0x5fe   : > { %3053 = vmatpush3.bf16.msra.mxu1 %v3050_v23 }
 0x5ff   : > { %3055 = vmatprep.subr.bf16.mxu1 %v3054_v29 }
 0x602   : > { %v2949_v59 = vpop.f32.mrb[18].mxu1  ;;  %3057 = vmatpush3.bf16.msra.mxu1 %v3054_v29 }
 0x603   : > { %v1653_v61 = vadd.f32 %v2949_v59, %v2713_v40  ;;  %v1647_v60 = vpop.f32.mrb[19].mxu1 }
 0x604   : > { %v1648_v16 = vadd.f32 %v2713_v40, %v1647_v60 }
 0x605   : > { %v4227_v63 = vadd.f32 %v1653_v61, %v4173_v7 }
 0x606   : > { %v4224_v17 = vadd.f32 %v1648_v16, %v4170_v5 }
 0x608   : > { %2961 = vmatprep.mubr.msk.f32.mxu0 %vm808_vm0, %v4224_v17 }
 0x609   : > { %2962 = vmatmul.mubr.msk.f32.gmra.mrb[26].mxu0 %vm808_vm0, %v4227_v63 }
 0x6a5   : > { %v2954_v43 = vpop.f32.mrb[20].mxu0 }
 0x6a6   : > { %1795 = vst.msk [vmem:[#allocation2 + $0x21] sm:$0xff] %vm808_vm0, %v2954_v43  ;;  %v1755_v0 = vpop.f32.mrb[21].mxu0  ;;  %v2018_v43 = vsel %vm678_vm1, %v2010_v55, %v1891_v6 }
 0x6a7   : > { %1794 = vst.msk [vmem:[#allocation2 + $0x11] sm:$0xff] %vm808_vm0, %v1755_v0 }
 0x6ad   : > { %v1835_v5 = vld [vmem:[#allocation2 + $0x21] sm:$0xff] }
 0x6ae   : > { %v4235_v7 = vld [vmem:[#allocation2 + $0x20] sm:$0xff]  ;;  %1956 = vrot.lane.b32.xlu0 %v1835_v5, %s3521_s23  ;;  %v4242_v27 = vld [vmem:[#allocation2 + $0x10] sm:$0xff] }
 0x6af   : > { %1924 = vrot.lane.b32.xlu1 %v4235_v7, %s3522_s1  ;;  %v1843_v9 = vld [vmem:[#allocation2 + $0x22] sm:$0xff]  ;;  %v1834_v11 = vld [vmem:[#allocation2 + $0x11] sm:$0xff] }
 0x6b0   : > { %v1819_v13 = vld [vmem:[#allocation2 + $0x12] sm:$0xff] }
 0x6b2   : > { %1988 = vrot.lane.b32.xlu0 %v1843_v9, %s3523_s30 }
 0x6b3   : > { %1862 = vrot.lane.b32.xlu1 %v1835_v5, %s4521_s17 }
 0x6b6   : > { %1922 = vrot.lane.b32.xlu0 %v4242_v27, %s3522_s1 }
 0x6b7   : > { %1894 = vrot.lane.b32.xlu1 %v1843_v9, %s3519_s4 }
 0x6b9   : > { %v2957_v10 = vpop.f32.mrb[22].mxu0 }
 0x6ba   : > { %1797 = vst.msk [vmem:[#allocation2 + $0x41] sm:$0xff] %vm808_vm0, %v2957_v10  ;;  %1954 = vrot.lane.b32.xlu0 %v1834_v11, %s3521_s23  ;;  %v1765_v12 = vpop.f32.mrb[23].mxu0 }
 0x6bb   : > { %1860 = vrot.lane.b32.xlu1 %v1834_v11, %s4521_s17  ;;  %1796 = vst.msk [vmem:[#allocation2 + $0x31] sm:$0xff] %vm808_vm0, %v1765_v12 }
 0x6bf   : > { %1892 = vrot.lane.b32.xlu1 %v1819_v13, %s3519_s4 }
 0x6c1   : > { %v1837_v14 = vld [vmem:[#allocation2 + $0x41] sm:$0xff] }
 0x6c2   : > { %1960 = vrot.lane.b32.xlu0 %v1837_v14, %s3521_s23  ;;  %v1845_v15 = vld [vmem:[#allocation2 + $0x42] sm:$0xff]  ;;  %v1813_v20 = vld [vmem:[#allocation2 + $0x31] sm:$0xff] }
 0x6c3   : > { %1986 = vrot.lane.b32.xlu1 %v1819_v13, %s3523_s30  ;;  %v4254_v18 = vld [vmem:[#allocation2 + $0x40] sm:$0xff]  ;;  %v4261_v2 = vld [vmem:[#allocation2 + $0x30] sm:$0xff] }
 0x6c4   : > { %v1821_v56 = vld [vmem:[#allocation2 + $0x32] sm:$0xff] }
 0x6c6   : > { %1992 = vrot.lane.b32.xlu0 %v1845_v15, %s3523_s30 }
 0x6c7   : > { %1928 = vrot.lane.b32.xlu1 %v4254_v18, %s3522_s1 }
 0x6ca   : > { %1864 = vrot.lane.b32.xlu0 %v1813_v20, %s4521_s17 }
 0x6cb   : > { %1866 = vrot.lane.b32.xlu1 %v1837_v14, %s4521_s17 }
 0x6cd   : > { %v2960_v24 = vpop.f32.mrb[24].mxu0 }
 0x6ce   : > { %1799 = vst.msk [vmem:[#allocation2 + $0x61] sm:$0xff] %vm808_vm0, %v2960_v24  ;;  %1926 = vrot.lane.b32.xlu0 %v4261_v2, %s3522_s1  ;;  %v1775_v26 = vpop.f32.mrb[25].mxu0 }
 0x6cf   : > { %1898 = vrot.lane.b32.xlu1 %v1845_v15, %s3519_s4  ;;  %1798 = vst.msk [vmem:[#allocation2 + $0x51] sm:$0xff] %vm808_vm0, %v1775_v26 }
 0x6d2   : > { %1958 = vrot.lane.b32.xlu0 %v1813_v20, %s3521_s23 }
 0x6d3   : > { %1896 = vrot.lane.b32.xlu1 %v1821_v56, %s3519_s4 }
 0x6d5   : > { %v1839_v28 = vld [vmem:[#allocation2 + $0x61] sm:$0xff] }
 0x6d6   : > { %1964 = vrot.lane.b32.xlu0 %v1839_v28, %s3521_s23  ;;  %v1847_v31 = vld [vmem:[#allocation2 + $0x62] sm:$0xff]  ;;  %v1815_v34 = vld [vmem:[#allocation2 + $0x51] sm:$0xff] }
 0x6d7   : > { %1990 = vrot.lane.b32.xlu1 %v1821_v56, %s3523_s30  ;;  %v4272_v30 = vld [vmem:[#allocation2 + $0x60] sm:$0xff]  ;;  %v4281_v35 = vld [vmem:[#allocation2 + $0x50] sm:$0xff] }
 0x6d8   : > { %v1823_v36 = vld [vmem:[#allocation2 + $0x52] sm:$0xff] }
 0x6da   : > { %1996 = vrot.lane.b32.xlu0 %v1847_v31, %s3523_s30 }
 0x6db   : > { %1932 = vrot.lane.b32.xlu1 %v4272_v30, %s3522_s1 }
 0x6dc   : > { %v2963_v32 = vpop.f32.mrb[26].mxu0 }
 0x6dd   : > { %1801 = vst.msk [vmem:[#allocation2 + $0x81] sm:$0xff] %vm808_vm0, %v2963_v32  ;;  %v1785_v33 = vpop.f32.mrb[27].mxu0 }
 0x6de   : > { %1800 = vst.msk [vmem:[#allocation2 + $0x71] sm:$0xff] %vm808_vm0, %v1785_v33  ;;  %1868 = vrot.lane.b32.xlu0 %v1815_v34, %s4521_s17 }
 0x6df   : > { %1870 = vrot.lane.b32.xlu1 %v1839_v28, %s4521_s17 }
 0x6e2   : > { %1930 = vrot.lane.b32.xlu0 %v4281_v35, %s3522_s1 }
 0x6e3   : > { %1902 = vrot.lane.b32.xlu1 %v1847_v31, %s3519_s4 }
 0x6e4   : > { %v1833_v38 = vld [vmem:[#allocation2 + $0x80] sm:$0xff] }
 0x6e5   : > { %v1817_v37 = vld [vmem:[#allocation2 + $0x71] sm:$0xff]  ;;  %v1841_v40 = vld [vmem:[#allocation2 + $0x81] sm:$0xff] }
 0x6e6   : > { %1962 = vrot.lane.b32.xlu0 %v1815_v34, %s3521_s23  ;;  %v4290_v39 = vld [vmem:[#allocation2 + $0x70] sm:$0xff]  ;;  %v1849_v42 = vld [vmem:[#allocation2 + $0x82] sm:$0xff] }
 0x6e7   : > { %1900 = vrot.lane.b32.xlu1 %v1823_v36, %s3519_s4  ;;  %v1825_v41 = vld [vmem:[#allocation2 + $0x72] sm:$0xff] }
 0x6ea   : > { %1872 = vrot.lane.b32.xlu0 %v1817_v37, %s4521_s17 }
 0x6eb   : > { %1994 = vrot.lane.b32.xlu1 %v1823_v36, %s3523_s30 }
 0x6ee   : > { %1934 = vrot.lane.b32.xlu0 %v4290_v39, %s3522_s1 }
 0x6ef   : > { %1936 = vrot.lane.b32.xlu1 %v1833_v38, %s3522_s1  ;;  %s4557_s1 = sld [smem:[#allocation31_spill]] }
 0x6f2   : > { %1966 = vrot.lane.b32.xlu0 %v1817_v37, %s3521_s23 }
 0x6f3   : > { %1968 = vrot.lane.b32.xlu1 %v1841_v40, %s3521_s23  ;;  %s660_s23 = scalar_lea.vmem [#allocation17], %s2669_s14  ;;  %s2763_s14 = sshll.u32 %s3637_s0, 10 }
 0x6f6   : > { %1998 = vrot.lane.b32.xlu0 %v1825_v41, %s3523_s30 }
 0x6f7   : > { %1904 = vrot.lane.b32.xlu1 %v1825_v41, %s3519_s4  ;;  %s4560_s4 = sld [smem:[#allocation32_spill]] }
 0x6fb   : > { %2000 = vrot.lane.b32.xlu1 %v1849_v42, %s3523_s30  ;;  %s2515_s30 = sshll.u32 %s660_s23, 4  ;;  %s4447_s30 = int_to_ptr.vmem [resolvable:$true] %s2515_s30 }
 0x6fc   : > { %s3424_s22 = scalar_lea.vmem %s4447_s30, 1024 }
 0x6fd   : > { %p3425_p12 = scmp.ne.s32.totalorder %s4447_s30, %s3424_s22 }
 0x6ff   : > { %p3426_p13 = pnand %p3425_p12, %p4562_p1 }
 0x701   : > { %p3427_p0 = pneg %p3426_p13 }
 0x720   : > { %v1957_v46 = vpop.permute.xlu0 %1956 }
 0x721   : > { %v1925_v47 = vpop.permute.xlu1 %1924 }
 0x724   : > { %v1989_v48 = vpop.permute.xlu0 %1988 }
 0x725   : > { %v1863_v49 = vpop.permute.xlu1 %1862 }
 0x726   : > { %v2012_v13 = vsel %vm808_vm0, %v4235_v7, %v1863_v49 }
 0x728   : > { %v1923_v53 = vpop.permute.xlu0 %1922 }
 0x729   : > { %v1895_v52 = vpop.permute.xlu1 %1894  ;;  %v2026_v1 = vsel %vm1193_vm3, %v2018_v43, %v1923_v53 }
 0x72a   : > { %v2020_v15 = vsel %vm678_vm1, %v2012_v13, %v1895_v52 }
 0x72c   : > { %v1955_v59 = vpop.permute.xlu0 %1954 }
 0x72d   : > { %v1861_v54 = vpop.permute.xlu1 %1860  ;;  %v2034_v21 = vsel %vm1202_vm4, %v2026_v1, %v1955_v59 }
 0x72e   : > { %v2011_v61 = vsel %vm808_vm0, %v4242_v27, %v1861_v54 }
 0x731   : > { %v1893_v60 = vpop.permute.xlu1 %1892 }
 0x732   : > { %v2019_v16 = vsel %vm678_vm1, %v2011_v61, %v1893_v60 }
 0x733   : > { %v2027_v0 = vsel %vm1193_vm3, %v2019_v16, %v1925_v47 }
 0x734   : > { %v2035_v19 = vsel %vm1202_vm4, %v2027_v0, %v1957_v46  ;;  %v1961_v4 = vpop.permute.xlu0 %1960 }
 0x735   : > { %v1987_v3 = vpop.permute.xlu1 %1986  ;;  %v2043_v5 = vsel %vm1211_vm5, %v2035_v19, %v1989_v48 }
 0x736   : > { %v2042_v22 = vsel %vm1211_vm5, %v2034_v21, %v1987_v3 }
 0x737   : > { %2976 = vmatprep.mubr.msk.f32.mxu1 %vm1233_vm6, %v2042_v22 }
 0x738   : > { %2977 = vmatmul.mubr.msk.f32.vlgmr.msra.gmra.mrb[20].mxu1 %vm1233_vm6, %v2043_v5  ;;  %v1993_v23 = vpop.permute.xlu0 %1992 }
 0x739   : > { %v1929_v25 = vpop.permute.xlu1 %1928 }
 0x73c   : > { %v1865_v9 = vpop.permute.xlu0 %1864 }
 0x73d   : > { %v1867_v8 = vpop.permute.xlu1 %1866  ;;  %v2013_v10 = vsel %vm808_vm0, %v4261_v2, %v1865_v9  ;;  %v2346_v9 = vld [vmem:[%s4557_s1 + $0x8] sm:$0xff] }
 0x73e   : > { %v2014_v44 = vsel %vm808_vm0, %v4254_v18, %v1867_v8  ;;  %v2345_v8 = vld [vmem:[%s4557_s1] sm:$0xff] }
 0x740   : > { %v1927_v27 = vpop.permute.xlu0 %1926 }
 0x741   : > { %v1899_v29 = vpop.permute.xlu1 %1898  ;;  %v2028_v24 = vsel %vm1193_vm3, %v2020_v15, %v1927_v27  ;;  %v2730_v27 = vld [vmem:[%s4558_s20] ss:$0 sm:$0xff] }
 0x742   : > { %v2022_v46 = vsel %vm678_vm1, %v2014_v44, %v1899_v29  ;;  %v3058_v29 = vpack.c.bf16 %v2346_v9, %v2345_v8 }
 0x744   : > { %v1959_v12 = vpop.permute.xlu0 %1958  ;;  %3059 = vmatprep.subr.bf16.mxu1 %v3058_v29 }
 0x745   : > { %v1897_v11 = vpop.permute.xlu1 %1896  ;;  %v2036_v56 = vsel %vm1202_vm4, %v2028_v24, %v1959_v12  ;;  %3061 = vmatpush3.bf16.msra.mxu1 %v3058_v29 }
 0x746   : > { %v2021_v14 = vsel %vm678_vm1, %v2013_v10, %v1897_v11 }
 0x747   : > { %v2029_v20 = vsel %vm1193_vm3, %v2021_v14, %v1929_v25 }
 0x748   : > { %v2037_v26 = vsel %vm1202_vm4, %v2029_v20, %v1961_v4  ;;  %v1965_v31 = vpop.permute.xlu0 %1964 }
 0x749   : > { %v1991_v28 = vpop.permute.xlu1 %1990  ;;  %v2045_v7 = vsel %vm1211_vm5, %v2037_v26, %v1993_v23 }
 0x74a   : > { %v2044_v2 = vsel %vm1211_vm5, %v2036_v56, %v1991_v28 }
 0x74b   : > { %2979 = vmatprep.mubr.msk.f32.mxu1 %vm1233_vm6, %v2044_v2 }
 0x74c   : > { %2980 = vmatmul.mubr.msk.f32.gmra.mrb[22].mxu1 %vm1233_vm6, %v2045_v7  ;;  %v1997_v32 = vpop.permute.xlu0 %1996 }
 0x74d   : > { %v1933_v33 = vpop.permute.xlu1 %1932 }
 0x750   : > { %v1869_v36 = vpop.permute.xlu0 %1868 }
 0x751   : > { %v1871_v34 = vpop.permute.xlu1 %1870  ;;  %v2015_v40 = vsel %vm808_vm0, %v4281_v35, %v1869_v36 }
 0x752   : > { %v2016_v16 = vsel %vm808_vm0, %v4272_v30, %v1871_v34 }
 0x754   : > { %v1931_v38 = vpop.permute.xlu0 %1930 }
 0x755   : > { %v1903_v37 = vpop.permute.xlu1 %1902  ;;  %v2030_v48 = vsel %vm1193_vm3, %v2022_v46, %v1931_v38 }
 0x756   : > { %v2024_v43 = vsel %vm678_vm1, %v2016_v16, %v1903_v37 }
 0x758   : > { %v1963_v42 = vpop.permute.xlu0 %1962 }
 0x759   : > { %v1901_v41 = vpop.permute.xlu1 %1900  ;;  %v2038_v52 = vsel %vm1202_vm4, %v2030_v48, %v1963_v42 }
 0x75a   : > { %v2023_v6 = vsel %vm678_vm1, %v2015_v40, %v1901_v41 }
 0x75b   : > { %v2031_v47 = vsel %vm1193_vm3, %v2023_v6, %v1933_v33 }
 0x75c   : > { %v2039_v49 = vsel %vm1202_vm4, %v2031_v47, %v1965_v31  ;;  %v1873_v54 = vpop.permute.xlu0 %1872 }
 0x75d   : > { %v1995_v53 = vpop.permute.xlu1 %1994  ;;  %v2047_v18 = vsel %vm1211_vm5, %v2039_v49, %v1997_v32  ;;  %v2017_v1 = vsel %vm808_vm0, %v4290_v39, %v1873_v54  ;;  %v2200_v39 = vld [vmem:[#allocation15] sm:$0xff] }
 0x75e   : > { %v2046_v35 = vsel %vm1211_vm5, %v2038_v52, %v1995_v53  ;;  %2988 = vmatprep.subr.mxu0 %v2200_v39 }
 0x75f   : > { %2982 = vmatprep.mubr.msk.f32.mxu1 %vm1233_vm6, %v2046_v35  ;;  %2989 = vmatpush3.msra.mxu0 %v2200_v39 }
 0x760   : > { %2983 = vmatmul.mubr.msk.f32.gmra.mrb[24].mxu1 %vm1233_vm6, %v2047_v18  ;;  %v1935_v59 = vpop.permute.xlu0 %1934 }
 0x761   : > { %v1937_v55 = vpop.permute.xlu1 %1936  ;;  %v2032_v0 = vsel %vm1193_vm3, %v2024_v43, %v1935_v59 }
 0x764   : > { %v1967_v60 = vpop.permute.xlu0 %1966 }
 0x765   : > { %v1969_v61 = vpop.permute.xlu1 %1968  ;;  %v2040_v19 = vsel %vm1202_vm4, %v2032_v0, %v1967_v60 }
 0x768   : > { %v1999_v3 = vpop.permute.xlu0 %1998 }
 0x769   : > { %v1905_v21 = vpop.permute.xlu1 %1904  ;;  %v2048_v22 = vsel %vm1211_vm5, %v2040_v19, %v1999_v3  ;;  %v2748_v3 = vld [vmem:[%s4560_s4] ss:$0 sm:$0xff]  ;;  %s3524_s4 = smov [#allocation17]  }
 0x76a   : > { %v2025_v4 = vsel %vm678_vm1, %v2017_v1, %v1905_v21  ;;  %2985 = vmatprep.mubr.msk.f32.mxu1 %vm1233_vm6, %v2048_v22 }
 0x76b   : > { %v2033_v5 = vsel %vm1193_vm3, %v2025_v4, %v1937_v55 }
 0x76c   : > { %v2041_v30 = vsel %vm1202_vm4, %v2033_v5, %v1969_v61 }
 0x76d   : > { %v2001_v23 = vpop.permute.xlu1 %2000 }
 0x76e   : > { %v2049_v25 = vsel %vm1211_vm5, %v2041_v30, %v2001_v23 }
 0x76f   : > { %2986 = vmatmul.mubr.msk.f32.gmra.mrb[26].mxu1 %vm1233_vm6, %v2049_v25 }
 0x80b   : > { %v2978_v10 = vpop.f32.mrb[20].mxu1 }
 0x80c   : > { %v2159_v11 = vadd.f32 %v2978_v10, %v2730_v27  ;;  %v2153_v12 = vpop.f32.mrb[21].mxu1 }
 0x80d   : > { %v2154_v13 = vadd.f32 %v2730_v27, %v2153_v12 }
 0x80e   : > { %v4369_v15 = vadd.f32 %v2159_v11, %v4197_v62 }
 0x80f   : > { %v4366_v14 = vadd.f32 %v2154_v13, %v4194_v45 }
 0x811   : > { %2990 = vmatprep.mubr.msk.f32.mxu0 %vm808_vm0, %v4366_v14 }
 0x812   : > { %2991 = vmatmul.mubr.msk.f32.vlgmr.msra.gmra.mrb[28].mxu0 %vm808_vm0, %v4369_v15 }
 0x81f   : > { %v2981_v20 = vpop.f32.mrb[22].mxu1 }
 0x820   : > { %v2169_v24 = vadd.f32 %v2981_v20, %v2730_v27  ;;  %v2163_v26 = vpop.f32.mrb[23].mxu1 }
 0x821   : > { %v2164_v56 = vadd.f32 %v2730_v27, %v2163_v26 }
 0x822   : > { %v4379_v31 = vadd.f32 %v2169_v24, %v4207_v51 }
 0x823   : > { %v4376_v28 = vadd.f32 %v2164_v56, %v4204_v50 }
 0x825   : > { %2993 = vmatprep.mubr.msk.f32.mxu0 %vm808_vm0, %v4376_v28 }
 0x826   : > { %2994 = vmatmul.mubr.msk.f32.gmra.mrb[30].mxu0 %vm808_vm0, %v4379_v31 }
 0x833   : > { %v2984_v45 = vpop.f32.mrb[24].mxu1 }
 0x834   : > { %v2179_v62 = vadd.f32 %v2984_v45, %v2730_v27  ;;  %v2173_v2 = vpop.f32.mrb[25].mxu1 }
 0x835   : > { %v2174_v7 = vadd.f32 %v2730_v27, %v2173_v2 }
 0x836   : > { %v4389_v33 = vadd.f32 %v2179_v62, %v4217_v58  ;;  %v2348_v58 = vld [vmem:[%s4557_s1 + $0x18] sm:$0xff] }
 0x837   : > { %v4386_v32 = vadd.f32 %v2174_v7, %v4214_v57  ;;  %v2347_v57 = vld [vmem:[%s4557_s1 + $0x10] sm:$0xff] }
 0x838   : > { %v3062_v40 = vpack.c.bf16 %v2348_v58, %v2347_v57 }
 0x839   : > { %2996 = vmatprep.mubr.msk.f32.mxu0 %vm808_vm0, %v4386_v32 }
 0x83a   : > { %2997 = vmatmul.mubr.msk.f32.gmra.mrb[32].mxu0 %vm808_vm0, %v4389_v33  ;;  %3063 = vmatprep.subr.bf16.mxu1 %v3062_v40 }
 0x83b   : > { %3065 = vmatpush3.bf16.msra.mxu1 %v3062_v40 }
 0x842   : > { %v2987_v50 = vpop.f32.mrb[26].mxu1 }
 0x843   : > { %v2189_v51 = vadd.f32 %v2987_v50, %v2730_v27  ;;  %v2183_v34 = vpop.f32.mrb[27].mxu1 }
 0x844   : > { %v2184_v36 = vadd.f32 %v2730_v27, %v2183_v34 }
 0x845   : > { %v4399_v38 = vadd.f32 %v2189_v51, %v4227_v63 }
 0x846   : > { %v4396_v37 = vadd.f32 %v2184_v36, %v4224_v17  ;;  %v2739_v17 = vld [vmem:[%s4559_s9] ss:$0 sm:$0xff]  ;;  %s4561_s9 = sld [smem:[#allocation33_spill]] }
 0x848   : > { %2999 = vmatprep.mubr.msk.f32.mxu0 %vm808_vm0, %v4396_v37 }
 0x849   : > { %3000 = vmatmul.mubr.msk.f32.gmra.mrb[34].mxu0 %vm808_vm0, %v4399_v38 }
 0x84c   : > { %s4444_s20 = scalar_lea.hbm %s4561_s9, %s2763_s14  ;;  %s3428_s14 = sshll.u32 %s3524_s4, 4  ;;  %s3429_s14 = int_to_ptr.vmem [resolvable:$false] %s3428_s14 }
 0x84d   : > { %s3430_s15 = scalar_lea.vmem %s3429_s14, 2048  ;;  %p3431_p2 = scmp.lt.s32.totalorder %s4447_s30, %s3429_s14 }
 0x84e   : > { %p3432_p8 = scmp.lt.s32.totalorder %s3430_s15, %s3424_s22 }
 0x850   : > { %p3433_p6 = por %p3432_p8, %p3431_p2 }
 0x852   : > { %p3434_p4 = pnand %p3433_p6, %p3427_p0 }
 0x8e5   : > { %v2992_v63 = vpop.f32.mrb[28].mxu0 }
 0x8e6   : > { %v2304_v41 = vadd.f32 %v2992_v63, %v2739_v17  ;;  %v2298_v42 = vpop.f32.mrb[29].mxu0 }
 0x8e7   : > { %v2299_v44 = vadd.f32 %v2739_v17, %v2298_v42 }
 0x8e8   : > { %v2338_v46 = vmax.f32 %v2304_v41, 0.0 }
 0x8e9   : > { %v2337_v6 = vmax.f32 %v2299_v44, 0.0 }
 0x8eb   : > { %3010 = vmatprep.mubr.msk.f32.mxu1 %vm1202_vm4, %v2337_v6 }
 0x8ec   : > { %3011 = vmatmul.mubr.msk.f32.vlgmr.msra.gmra.mrb[28].mxu1 %vm1202_vm4, %v2338_v46 }
 0x8f9   : > { %v2995_v47 = vpop.f32.mrb[30].mxu0 }
 0x8fa   : > { %v2314_v48 = vadd.f32 %v2995_v47, %v2739_v17  ;;  %v2308_v49 = vpop.f32.mrb[31].mxu0 }
 0x8fb   : > { %v2309_v52 = vadd.f32 %v2739_v17, %v2308_v49 }
 0x8fc   : > { %v2340_v54 = vmax.f32 %v2314_v48, 0.0 }
 0x8fd   : > { %v2339_v53 = vmax.f32 %v2309_v52, 0.0 }
 0x8ff   : > { %3013 = vmatprep.mubr.msk.f32.mxu1 %vm1202_vm4, %v2339_v53 }
 0x900   : > { %3014 = vmatmul.mubr.msk.f32.gmra.mrb[30].mxu1 %vm1202_vm4, %v2340_v54 }
 0x90d   : > { %v2998_v35 = vpop.f32.mrb[32].mxu0 }
 0x90e   : > { %v2324_v18 = vadd.f32 %v2998_v35, %v2739_v17  ;;  %v2318_v55 = vpop.f32.mrb[33].mxu0 }
 0x90f   : > { %v2319_v59 = vadd.f32 %v2739_v17, %v2318_v55 }
 0x910   : > { %v2342_v60 = vmax.f32 %v2324_v18, 0.0 }
 0x911   : > { %v2341_v61 = vmax.f32 %v2319_v59, 0.0 }
 0x913   : > { %3016 = vmatprep.mubr.msk.f32.mxu1 %vm1202_vm4, %v2341_v61 }
 0x914   : > { %3017 = vmatmul.mubr.msk.f32.gmra.mrb[32].mxu1 %vm1202_vm4, %v2342_v60 }
 0x91c   : > { %v3001_v16 = vpop.f32.mrb[34].mxu0 }
 0x91d   : > { %v2334_v43 = vadd.f32 %v3001_v16, %v2739_v17  ;;  %v2328_v0 = vpop.f32.mrb[35].mxu0 }
 0x91e   : > { %v2329_v1 = vadd.f32 %v2739_v17, %v2328_v0 }
 0x91f   : > { %v2344_v21 = vmax.f32 %v2334_v43, 0.0 }
 0x920   : > { %v2343_v19 = vmax.f32 %v2329_v1, 0.0 }
 0x922   : > { %3019 = vmatprep.mubr.msk.f32.mxu1 %vm1202_vm4, %v2343_v19 }
 0x923   : > { %3020 = vmatmul.mubr.msk.f32.gmra.mrb[34].mxu1 %vm1202_vm4, %v2344_v21 }
 0x9bf   : > { %v3012_v4 = vpop.f32.mrb[28].mxu1 }
 0x9c0   : > { %v2452_v22 = vadd.f32 %v3012_v4, %v2748_v3  ;;  %v2446_v5 = vpop.f32.mrb[29].mxu1 }
 0x9c1   : > { %v2447_v30 = vadd.f32 %v2748_v3, %v2446_v5 }
 0x9c2   : > { %v2486_v23 = vadd.f32 %v2452_v22, %v4369_v15 }
 0x9c3   : > { %v2485_v25 = vadd.f32 %v2447_v30, %v4366_v14 }
 0x9c4   : > { %2494 = vst.msk [vmem:[%s660_s23 + $0x8] sm:$0xff] %vm808_vm0, %v2486_v23 }
 0x9c5   : > { %2493 = vst.msk [vmem:[%s660_s23] sm:$0xff] %vm808_vm0, %v2485_v25 }
 0x9d3   : > { %v3015_v39 = vpop.f32.mrb[30].mxu1 }
 0x9d4   : > { %v2462_v8 = vadd.f32 %v3015_v39, %v2748_v3  ;;  %v2456_v9 = vpop.f32.mrb[31].mxu1 }
 0x9d5   : > { %v2457_v29 = vadd.f32 %v2748_v3, %v2456_v9 }
 0x9d6   : > { %v2488_v27 = vadd.f32 %v2462_v8, %v4379_v31 }
 0x9d7   : > { %v2487_v10 = vadd.f32 %v2457_v29, %v4376_v28 }
 0x9d8   : > { %2496 = vst.msk [vmem:[%s660_s23 + $0x18] sm:$0xff] %vm808_vm0, %v2488_v27 }
 0x9d9   : > { %2495 = vst.msk [vmem:[%s660_s23 + $0x10] sm:$0xff] %vm808_vm0, %v2487_v10 }
 0x9e7   : > { %v3018_v11 = vpop.f32.mrb[32].mxu1 }
 0x9e8   : > { %v2472_v12 = vadd.f32 %v3018_v11, %v2748_v3  ;;  %v2466_v13 = vpop.f32.mrb[33].mxu1 }
 0x9e9   : > { %v2467_v14 = vadd.f32 %v2748_v3, %v2466_v13 }
 0x9ea   : > { %v2490_v15 = vadd.f32 %v2472_v12, %v4389_v33 }
 0x9eb   : > { %v2489_v20 = vadd.f32 %v2467_v14, %v4386_v32 }
 0x9ec   : > { %2498 = vst.msk [vmem:[%s660_s23 + $0x28] sm:$0xff] %vm808_vm0, %v2490_v15 }
 0x9ed   : > { %2497 = vst.msk [vmem:[%s660_s23 + $0x20] sm:$0xff] %vm808_vm0, %v2489_v20 }
 0x9f6   : > { %v3021_v24 = vpop.f32.mrb[34].mxu1 }
 0x9f7   : > { %v2482_v26 = vadd.f32 %v3021_v24, %v2748_v3  ;;  %v2476_v56 = vpop.f32.mrb[35].mxu1 }
 0x9f8   : > { %v2477_v28 = vadd.f32 %v2748_v3, %v2476_v56 }
 0x9f9   : > { %v2492_v31 = vadd.f32 %v2482_v26, %v4399_v38 }
 0x9fa   : > { %v2491_v45 = vadd.f32 %v2477_v28, %v4396_v37 }
 0x9fb   : > { %2500 = vst.msk [vmem:[%s660_s23 + $0x38] sm:$0xff] %vm808_vm0, %v2492_v31 }
 0x9fc   : > { %2499 = vst.msk [vmem:[%s660_s23 + $0x30] sm:$0xff] %vm808_vm0, %v2491_v45 }
 0x9fd   : > { %3437 = shalt.err (!%p3434_p4)
}
 0x9fe   : > { %s3438_s23 = scalar_lea.hbm %s4444_s20, 1024  ;;  %s3442_s4 = scalar_lea.hbm %s4561_s9, 2048 }
 0x9ff   : > { %p3439_p11 = scmp.ne.s32.totalorder %s4444_s20, %s3438_s23  ;;  %p3443_p9 = scmp.lt.u32.totalorder %s4444_s20, %s4561_s9 }
 0xa00   : > { %p3444_p7 = scmp.lt.u32.totalorder %s3442_s4, %s3438_s23  ;;  %p3446_p12 = scmp.lt.u32.totalorder %s3438_s23, %s4444_s20 }
 0xa01   : > { %p3440_p3 = pnand %p3439_p11, %p4562_p1 }
 0xa02   : > { %p3445_p10 = por %p3444_p7, %p3443_p9 }
 0xa03   : > { %p3441_p5 = pneg %p3440_p3 }
 0xa04   : > { %p3447_p13 = por %p3446_p12, %p3445_p10 }
 0xa06   : > { %p3448_p0 = pnand %p3447_p13, %p3441_p5 }
 0xa08   : > { %3451 = shalt.err (!%p3448_p0)
}
 0xa09   : > { %s3525_s22 = smov 128   ;;  %s4563_s15 = smov 8  }
 0xa0a   : > { %s4564_s1 = scalar_lea.sflag [#allocation5], %s3905_s28 }
 0xa0b   : > { %3102 = dma.vmem_to_hbm [thread:$0]  (%p4562_p1), %s4447_s30, 1024, %s4444_s20, %s4564_s1, %s3525_s22, %s3525_s22, %s4563_s15  }
 0xa0c PF: > { %s2530_s17 = sand.u32 1, %s3494_s24   ;;  %p4565_p2 = scmp.ne.s32.totalorder %s4541_s29, 0 }
 0xa0d   : > { %p4566_p8 = scmp.ge.s32.totalorder %s3506_s27, 2  ;;  %s2531_s0 = scalar_lea.sflag [#allocation5], %s2530_s17 }
 0xa0f   : > { %p3131_p6 = pnand %p4566_p8, %p4565_p2 }
 0xa11   : > { %3489 = dma.done.wait (!%p3131_p6), %s2531_s0, 1024  }
 0xa12   : > { %3491 = vsyncadd (!%p3131_p6), %s2531_s0, 4294966272  ;;  %p34_p4 = scmp.ge.s32.totalorder %s3829_s21, 4   ;;  %s4567_s24 = smov %s3498_s25 }
 0xa13   : > { %s4568_s25 = smov %s3502_s26  ;;  %s4569_s26 = smov %s3841_s18 }
 0xa14   : > { %s4570_s27 = smov %s3829_s21  ;;  %36 = sbr.rel (!%p34_p4) target bundleno = 20 (0x14), region = 162 }
 0xa1b   :  { %2536 = vsyncpa [#allocation4], 1 }
 0xa1c   :  { %2538 = vsyncpa [#allocation4 + $0x1], 1 }
 0xa1d   :  { %2539 = vsyncpa [#allocation7], 1 }
 0xa1e   :  { %2540 = vsyncpa [#allocation10], 1 }
 0xa1f   :  { %2541 = vsyncpa [#allocation13], 1 }
 0xa20   :  { %2542 = vsyncpa [#allocation16], 1 }
 0xa21   :  { %2543 = vsyncpa [#allocation5], 1 }
 0xa22   :  { %2545 = vsyncpa [#allocation5 + $0x1], 1 }

</bundles_post_ra>
